<compile_context>
chip_gen: v6e
topology: v6e:2x2x1
jax: 0.10.0
libtpu: 0.0.40
codegen_flags: <defaults>
</compile_context>

<pallas_src>
import math

import jax
import jax.numpy as jnp
from jax import lax
from jax.experimental import pallas as pl
from jax.experimental.pallas import tpu as pltpu


def _round_up(x: int, m: int) -> int:
    return ((x + m - 1) // m) * m


def _nbytes(shape, dtype) -> int:
    n = 1
    for s in shape:
        n *= int(s)
    return n * jnp.dtype(dtype).itemsize


def make_rnn_embed_kernel(num_layers: int, seq_len: int, tile_b: int,
                          hidden_pad: int, has_scratch: bool):
    """Stacked tanh-RNN + final Linear for one batch tile.

    Kernel ref order (per grid step over batch tiles):
      x_ref            : (T, tile_b, E_pad)   compute_dtype (time-major embeds)
      w_ih[0..L-1]     : (E_pad|H_pad, H_pad) compute_dtype
      w_hh[0..L-1]     : (H_pad, H_pad)       compute_dtype
      b[0..L-1]        : (1, H_pad)           float32  (b_ih + b_hh)
      w_lin            : (H_pad, O_pad)       compute_dtype
      b_lin            : (1, O_pad)           float32
      out_ref          : (tile_b, O_pad)      float32
      seq_ref          : (T, tile_b, H_pad)   compute_dtype scratch (L > 1 only)
    """
    L, T, TB, H = num_layers, seq_len, tile_b, hidden_pad

    def kernel(*refs):
        x_ref = refs[0]
        w_ih_refs = refs[1:1 + L]
        w_hh_refs = refs[1 + L:1 + 2 * L]
        b_refs = refs[1 + 2 * L:1 + 3 * L]
        w_lin_ref = refs[1 + 3 * L]
        b_lin_ref = refs[2 + 3 * L]
        out_ref = refs[3 + 3 * L]
        seq_ref = refs[4 + 3 * L] if has_scratch else None

        h_c = None
        for l in range(L):                       # static layer loop
            # ---- Phase 1: hoisted batched input projection for all T steps.
            inp = x_ref[...] if l == 0 else seq_ref[...]
            in_dim = inp.shape[-1]
            w_ih = w_ih_refs[l][...]
            w_hh = w_hh_refs[l][...]
            # TB % 8 == 0 and in_dim % 128 == 0 -> reshape is a free relayout.
            proj = jnp.dot(inp.reshape(T * TB, in_dim), w_ih,
                           preferred_element_type=jnp.float32)
            proj = (proj + b_refs[l][...]).reshape(T, TB, H)   # bias folded once

            # ---- Phase 2: serial recurrence (fully unrolled, T static).
            # Only (TB,H)@(H,H) + tanh on the critical path; h stays in regs.
            h = jnp.zeros((TB, H), jnp.float32)
            h_c = h.astype(w_hh.dtype)
            for t in range(T):
                pre = proj[t] + jnp.dot(h_c, w_hh,
                                        preferred_element_type=jnp.float32)
                h = jnp.tanh(pre)                               # f32 tanh
                h_c = h.astype(w_hh.dtype)
                if l < L - 1:
                    seq_ref[t] = h_c          # lane-dense (H_pad % 128 == 0)

        # out = Linear(h_T of the top layer)  ==  Linear(out[:, -1, :])
        out = (jnp.dot(h_c, w_lin_ref[...], preferred_element_type=jnp.float32)
               + b_lin_ref[...])
        out_ref[...] = out.astype(out_ref.dtype)

    return kernel


def init_params(key, vocab_len, embed_size, hidden_dim, output_dim, num_layers):
    """Deterministic synthetic parameters with PyTorch-like init scales."""
    keys = jax.random.split(key, 3 + 4 * num_layers)
    ki = iter(keys)
    params = {}
    params["embed"] = jax.random.normal(next(ki), (vocab_len, embed_size),
                                        dtype=jnp.float32)     # nn.Embedding
    stdv = 1.0 / math.sqrt(hidden_dim)
    w_ih, w_hh, b = [], [], []
    for l in range(num_layers):
        in_dim = embed_size if l == 0 else hidden_dim
        w_ih.append(jax.random.uniform(next(ki), (in_dim, hidden_dim),
                                       minval=-stdv, maxval=stdv,
                                       dtype=jnp.float32))
        w_hh.append(jax.random.uniform(next(ki), (hidden_dim, hidden_dim),
                                       minval=-stdv, maxval=stdv,
                                       dtype=jnp.float32))
        b_ih = jax.random.uniform(next(ki), (hidden_dim,),
                                  minval=-stdv, maxval=stdv, dtype=jnp.float32)
        b_hh = jax.random.uniform(next(ki), (hidden_dim,),
                                  minval=-stdv, maxval=stdv, dtype=jnp.float32)
        b.append((b_ih + b_hh).reshape(1, hidden_dim))
    params["w_ih"], params["w_hh"], params["b"] = w_ih, w_hh, b
    params["w_lin"] = jax.random.uniform(next(ki), (hidden_dim, output_dim),
                                         minval=-stdv, maxval=stdv,
                                         dtype=jnp.float32)
    params["b_lin"] = jax.random.uniform(next(ki), (1, output_dim),
                                         minval=-stdv, maxval=stdv,
                                         dtype=jnp.float32)
    return params


def rnn_embed_forward(tokens, params, *, hidden_dim, output_dim, num_layers,
                      compute_dtype=jnp.float32):
    """Pallas-backed forward pass of RNNEmbed. tokens: (B, T) int."""
    tokens = tokens.astype(jnp.int32)            # x.type(torch.int64) equivalent
    B, T = tokens.shape
    E = params["embed"].shape[1]

    # Lane-dense padding (all contraction / N dims multiples of 128).
    H_pad = _round_up(hidden_dim, 128)
    E_pad = _round_up(E, 128)
    O_pad = _round_up(output_dim, 128)

    # Batch tiling: tile_b rows per grid step (multiple of 8, up to 128).
    if B <= 128:
        tile_b = _round_up(max(B, 1), 8)
        B_pad = tile_b
    else:
        tile_b = 128
        B_pad = _round_up(B, tile_b)
    n_tiles = B_pad // tile_b

    # Embedding gather directly into time-major layout: (T, B) ids -> (T, B, E).
    # TODO(synk): in-kernel gather via scalar-prefetched ids + per-row DMA.
    x_tbe = jnp.take(params["embed"], tokens.T, axis=0)
    x_tbe = jnp.pad(x_tbe, ((0, 0), (0, B_pad - B), (0, E_pad - E)))
    x_tbe = x_tbe.astype(compute_dtype)

    # Zero-pad weights to the lane-dense shapes (exact: padded rows/cols are 0).
    w_ih, w_hh, biases = [], [], []
    for l in range(num_layers):
        in_dim = E if l == 0 else hidden_dim
        in_pad = E_pad if l == 0 else H_pad
        w_ih.append(jnp.pad(params["w_ih"][l],
                            ((0, in_pad - in_dim), (0, H_pad - hidden_dim))
                            ).astype(compute_dtype))
        w_hh.append(jnp.pad(params["w_hh"][l],
                            ((0, H_pad - hidden_dim), (0, H_pad - hidden_dim))
                            ).astype(compute_dtype))
        biases.append(jnp.pad(params["b"][l],
                              ((0, 0), (0, H_pad - hidden_dim))))      # f32
    w_lin = jnp.pad(params["w_lin"],
                    ((0, H_pad - hidden_dim), (0, O_pad - output_dim))
                    ).astype(compute_dtype)
    b_lin = jnp.pad(params["b_lin"], ((0, 0), (0, O_pad - output_dim)))  # f32

    inputs = [x_tbe] + w_ih + w_hh + biases + [w_lin, b_lin]

    # --- BlockSpecs: x/out tiled over the batch grid axis, weights resident. ---
    def whole(arr):
        return pl.BlockSpec(arr.shape, lambda b_idx, nd=arr.ndim: (0,) * nd)

    in_specs = ([pl.BlockSpec((T, tile_b, E_pad), lambda b_idx: (0, b_idx, 0))]
                + [whole(a) for a in inputs[1:]])
    out_spec = pl.BlockSpec((tile_b, O_pad), lambda b_idx: (b_idx, 0))

    has_scratch = num_layers > 1
    scratch_shapes = ([pltpu.VMEM((T, tile_b, H_pad), compute_dtype)]
                      if has_scratch else [])

    # --- VMEM budget: resident weights + double-buffered x/out + scratch. ---
    weight_bytes = sum(_nbytes(a.shape, a.dtype) for a in inputs[1:])
    stream_bytes = (2 * _nbytes((T, tile_b, E_pad), compute_dtype)
                    + 2 * _nbytes((tile_b, O_pad), jnp.float32))
    scratch_bytes = (_nbytes((T, tile_b, H_pad), compute_dtype)
                     if has_scratch else 0)
    footprint = weight_bytes + stream_bytes + scratch_bytes
    # 2x headroom, clamped to stay within v7x's 64 MiB per-TC VMEM.
    vmem_limit = int(min(max(2 * footprint, 4 * 1024 * 1024), 48 * 1024 * 1024))

    kernel = make_rnn_embed_kernel(num_layers, T, tile_b, H_pad, has_scratch)
    out = pl.pallas_call(
        kernel,
        out_shape=jax.ShapeDtypeStruct((B_pad, O_pad), jnp.float32),
        grid_spec=pltpu.PrefetchScalarGridSpec(
            num_scalar_prefetch=0,
            grid=(n_tiles,),
            in_specs=in_specs,
            out_specs=out_spec,
            scratch_shapes=scratch_shapes),
        compiler_params=pltpu.CompilerParams(
            dimension_semantics=("parallel",),
            vmem_limit_bytes=vmem_limit),
    )(*inputs)
    return out[:B, :output_dim]


def rnn_embed_reference(tokens, params, *, hidden_dim, num_layers):
    """Pure-JAX reference matching PyTorch nn.RNN (tanh, batch_first, eval)."""
    tokens = tokens.astype(jnp.int32)
    B, T = tokens.shape
    x = jnp.take(params["embed"], tokens, axis=0)        # (B, T, E)
    inp = x
    for l in range(num_layers):
        w_ih = params["w_ih"][l]
        w_hh = params["w_hh"][l]
        b = params["b"][l]
        h0 = jnp.zeros((B, hidden_dim), jnp.float32)

        def step(h, x_t):
            h_new = jnp.tanh(x_t @ w_ih + h @ w_hh + b)
            return h_new, h_new

        _, outs = lax.scan(step, h0, jnp.transpose(inp, (1, 0, 2)))
        inp = jnp.transpose(outs, (1, 0, 2))              # (B, T, H)
    last = inp[:, -1, :]
    return last @ params["w_lin"] + params["b_lin"]


if __name__ == "__main__":
    VOCAB = 50
    EMBED = 32
    HIDDEN = 32
    OUTPUT = 8
    NUM_LAYERS = 2
    B, T = 2, 8

    key = jax.random.PRNGKey(0)
    k_tok, k_par = jax.random.split(key)
    tokens = jax.random.randint(k_tok, (B, T), 0, VOCAB, dtype=jnp.int32)
    params = init_params(k_par, VOCAB, EMBED, HIDDEN, OUTPUT, NUM_LAYERS)

    ref = jax.block_until_ready(
        rnn_embed_reference(tokens, params,
                            hidden_dim=HIDDEN, num_layers=NUM_LAYERS))

    # f32 path: bit-tight check against the f32 reference.
    out_f32 = jax.block_until_ready(
        rnn_embed_forward(tokens, params, hidden_dim=HIDDEN,
                          output_dim=OUTPUT, num_layers=NUM_LAYERS,
                          compute_dtype=jnp.float32))
    assert out_f32.shape == (B, OUTPUT), out_f32.shape
    assert jnp.allclose(out_f32, ref, atol=1e-5, rtol=1e-5), (out_f32, ref)

    # bf16 path (rated MXU path on v6e/v7x): loose tolerance vs f32 reference.
    out_bf16 = jax.block_until_ready(
        rnn_embed_forward(tokens, params, hidden_dim=HIDDEN,
                          output_dim=OUTPUT, num_layers=NUM_LAYERS,
                          compute_dtype=jnp.bfloat16))
    assert out_bf16.shape == (B, OUTPUT), out_bf16.shape
    assert jnp.allclose(out_bf16, ref, atol=5e-2, rtol=5e-2), (out_bf16, ref)

    print("KERNEL_OK")
</pallas_src>

<mosaic_0001>
module attributes {stable_mosaic.version = 11 : i64} {
  func.func @kernel(%arg0: i32, %arg1: memref<8x8x128xf32, #tpu.memory_space<vmem>>, %arg2: memref<128x128xf32, #tpu.memory_space<vmem>>, %arg3: memref<128x128xf32, #tpu.memory_space<vmem>>, %arg4: memref<128x128xf32, #tpu.memory_space<vmem>>, %arg5: memref<128x128xf32, #tpu.memory_space<vmem>>, %arg6: memref<1x128xf32, #tpu.memory_space<vmem>>, %arg7: memref<1x128xf32, #tpu.memory_space<vmem>>, %arg8: memref<128x128xf32, #tpu.memory_space<vmem>>, %arg9: memref<1x128xf32, #tpu.memory_space<vmem>>, %arg10: memref<8x128xf32, #tpu.memory_space<vmem>>, %arg11: memref<8x8x128xf32, #tpu.memory_space<vmem>>) attributes {dimension_semantics = [#tpu.dimension_semantics<parallel>], iteration_bounds = array<i64: 1>, scalar_prefetch = 0 : i64, scratch_operands = 1 : i64, tpu.core_type = #tpu.core_type<tc>, window_params = [{transform_indices = @transform_0, window_bounds = array<i64: 8, 8, 128>}, {pipeline_mode = #tpu.pipeline_mode<synchronous>, transform_indices = @transform_1, window_bounds = array<i64: 128, 128>}, {pipeline_mode = #tpu.pipeline_mode<synchronous>, transform_indices = @transform_2, window_bounds = array<i64: 128, 128>}, {pipeline_mode = #tpu.pipeline_mode<synchronous>, transform_indices = @transform_3, window_bounds = array<i64: 128, 128>}, {pipeline_mode = #tpu.pipeline_mode<synchronous>, transform_indices = @transform_4, window_bounds = array<i64: 128, 128>}, {pipeline_mode = #tpu.pipeline_mode<synchronous>, transform_indices = @transform_5, window_bounds = array<i64: 1, 128>}, {pipeline_mode = #tpu.pipeline_mode<synchronous>, transform_indices = @transform_6, window_bounds = array<i64: 1, 128>}, {pipeline_mode = #tpu.pipeline_mode<synchronous>, transform_indices = @transform_7, window_bounds = array<i64: 128, 128>}, {pipeline_mode = #tpu.pipeline_mode<synchronous>, transform_indices = @transform_8, window_bounds = array<i64: 1, 128>}, {transform_indices = @transform_9, window_bounds = array<i64: 8, 128>}]} {
    %c0 = arith.constant 0 : index
    %c0_0 = arith.constant 0 : index
    %c0_1 = arith.constant 0 : index
    %0 = vector.load %arg1[%c0, %c0_0, %c0_1] : memref<8x8x128xf32, #tpu.memory_space<vmem>>, vector<8x8x128xf32>
    %c0_2 = arith.constant 0 : index
    %c0_3 = arith.constant 0 : index
    %1 = vector.load %arg2[%c0_2, %c0_3] : memref<128x128xf32, #tpu.memory_space<vmem>>, vector<128x128xf32>
    %c0_4 = arith.constant 0 : index
    %c0_5 = arith.constant 0 : index
    %2 = vector.load %arg4[%c0_4, %c0_5] : memref<128x128xf32, #tpu.memory_space<vmem>>, vector<128x128xf32>
    %3 = vector.shape_cast %0 : vector<8x8x128xf32> to vector<64x128xf32>
    %cst = arith.constant dense<0.000000e+00> : vector<64x128xf32>
    %4 = tpu.matmul %3, %1, %cst {dimension_numbers = #tpu.dot_dimension_numbers<[1], [0], [0], [1], [0, 0, 1, 1], [], []>} : vector<64x128xf32>, vector<128x128xf32>, vector<64x128xf32> -> vector<64x128xf32>
    %c0_6 = arith.constant 0 : index
    %c0_7 = arith.constant 0 : index
    %5 = vector.load %arg6[%c0_6, %c0_7] : memref<1x128xf32, #tpu.memory_space<vmem>>, vector<1x128xf32>
    %6 = vector.broadcast %5 : vector<1x128xf32> to vector<64x128xf32>
    %7 = arith.addf %4, %6 : vector<64x128xf32>
    %8 = vector.shape_cast %7 : vector<64x128xf32> to vector<8x8x128xf32>
    %cst_8 = arith.constant 0.000000e+00 : f32
    %9 = vector.broadcast %cst_8 : f32 to vector<8x128xf32>
    %10 = vector.extract_strided_slice %8 {offsets = [0, 0, 0], sizes = [1, 8, 128], strides = [1, 1, 1]} : vector<8x8x128xf32> to vector<1x8x128xf32>
    %11 = vector.shape_cast %10 : vector<1x8x128xf32> to vector<8x128xf32>
    %cst_9 = arith.constant dense<0.000000e+00> : vector<8x128xf32>
    %12 = tpu.matmul %9, %2, %cst_9 {dimension_numbers = #tpu.dot_dimension_numbers<[1], [0], [0], [1], [0, 0, 1, 1], [], []>} : vector<8x128xf32>, vector<128x128xf32>, vector<8x128xf32> -> vector<8x128xf32>
    %13 = arith.addf %11, %12 : vector<8x128xf32>
    %14 = math.tanh %13 : vector<8x128xf32>
    %c0_10 = arith.constant 0 : index
    %c0_11 = arith.constant 0 : index
    %c0_12 = arith.constant 0 : index
    %15 = vector.load %arg11[%c0_10, %c0_11, %c0_12] : memref<8x8x128xf32, #tpu.memory_space<vmem>>, vector<1x8x128xf32>
    %16 = vector.shape_cast %15 : vector<1x8x128xf32> to vector<8x128xf32>
    %17 = vector.shape_cast %14 : vector<8x128xf32> to vector<1x8x128xf32>
    tpu.vector_store %arg11[%c0_10, %c0_11, %c0_12], %17 {strides = array<i32>} : memref<8x8x128xf32, #tpu.memory_space<vmem>>, vector<1x8x128xf32>,
    %18 = vector.extract_strided_slice %8 {offsets = [1, 0, 0], sizes = [1, 8, 128], strides = [1, 1, 1]} : vector<8x8x128xf32> to vector<1x8x128xf32>
    %19 = vector.shape_cast %18 : vector<1x8x128xf32> to vector<8x128xf32>
    %cst_13 = arith.constant dense<0.000000e+00> : vector<8x128xf32>
    %20 = tpu.matmul %14, %2, %cst_13 {dimension_numbers = #tpu.dot_dimension_numbers<[1], [0], [0], [1], [0, 0, 1, 1], [], []>} : vector<8x128xf32>, vector<128x128xf32>, vector<8x128xf32> -> vector<8x128xf32>
    %21 = arith.addf %19, %20 : vector<8x128xf32>
    %22 = math.tanh %21 : vector<8x128xf32>
    %c1 = arith.constant 1 : index
    %c0_14 = arith.constant 0 : index
    %c0_15 = arith.constant 0 : index
    %23 = vector.load %arg11[%c1, %c0_14, %c0_15] : memref<8x8x128xf32, #tpu.memory_space<vmem>>, vector<1x8x128xf32>
    %24 = vector.shape_cast %23 : vector<1x8x128xf32> to vector<8x128xf32>
    %25 = vector.shape_cast %22 : vector<8x128xf32> to vector<1x8x128xf32>
    tpu.vector_store %arg11[%c1, %c0_14, %c0_15], %25 {strides = array<i32>} : memref<8x8x128xf32, #tpu.memory_space<vmem>>, vector<1x8x128xf32>,
    %26 = vector.extract_strided_slice %8 {offsets = [2, 0, 0], sizes = [1, 8, 128], strides = [1, 1, 1]} : vector<8x8x128xf32> to vector<1x8x128xf32>
    %27 = vector.shape_cast %26 : vector<1x8x128xf32> to vector<8x128xf32>
    %cst_16 = arith.constant dense<0.000000e+00> : vector<8x128xf32>
    %28 = tpu.matmul %22, %2, %cst_16 {dimension_numbers = #tpu.dot_dimension_numbers<[1], [0], [0], [1], [0, 0, 1, 1], [], []>} : vector<8x128xf32>, vector<128x128xf32>, vector<8x128xf32> -> vector<8x128xf32>
    %29 = arith.addf %27, %28 : vector<8x128xf32>
    %30 = math.tanh %29 : vector<8x128xf32>
    %c2 = arith.constant 2 : index
    %c0_17 = arith.constant 0 : index
    %c0_18 = arith.constant 0 : index
    %31 = vector.load %arg11[%c2, %c0_17, %c0_18] : memref<8x8x128xf32, #tpu.memory_space<vmem>>, vector<1x8x128xf32>
    %32 = vector.shape_cast %31 : vector<1x8x128xf32> to vector<8x128xf32>
    %33 = vector.shape_cast %30 : vector<8x128xf32> to vector<1x8x128xf32>
    tpu.vector_store %arg11[%c2, %c0_17, %c0_18], %33 {strides = array<i32>} : memref<8x8x128xf32, #tpu.memory_space<vmem>>, vector<1x8x128xf32>,
    %34 = vector.extract_strided_slice %8 {offsets = [3, 0, 0], sizes = [1, 8, 128], strides = [1, 1, 1]} : vector<8x8x128xf32> to vector<1x8x128xf32>
    %35 = vector.shape_cast %34 : vector<1x8x128xf32> to vector<8x128xf32>
    %cst_19 = arith.constant dense<0.000000e+00> : vector<8x128xf32>
    %36 = tpu.matmul %30, %2, %cst_19 {dimension_numbers = #tpu.dot_dimension_numbers<[1], [0], [0], [1], [0, 0, 1, 1], [], []>} : vector<8x128xf32>, vector<128x128xf32>, vector<8x128xf32> -> vector<8x128xf32>
    %37 = arith.addf %35, %36 : vector<8x128xf32>
    %38 = math.tanh %37 : vector<8x128xf32>
    %c3 = arith.constant 3 : index
    %c0_20 = arith.constant 0 : index
    %c0_21 = arith.constant 0 : index
    %39 = vector.load %arg11[%c3, %c0_20, %c0_21] : memref<8x8x128xf32, #tpu.memory_space<vmem>>, vector<1x8x128xf32>
    %40 = vector.shape_cast %39 : vector<1x8x128xf32> to vector<8x128xf32>
    %41 = vector.shape_cast %38 : vector<8x128xf32> to vector<1x8x128xf32>
    tpu.vector_store %arg11[%c3, %c0_20, %c0_21], %41 {strides = array<i32>} : memref<8x8x128xf32, #tpu.memory_space<vmem>>, vector<1x8x128xf32>,
    %42 = vector.extract_strided_slice %8 {offsets = [4, 0, 0], sizes = [1, 8, 128], strides = [1, 1, 1]} : vector<8x8x128xf32> to vector<1x8x128xf32>
    %43 = vector.shape_cast %42 : vector<1x8x128xf32> to vector<8x128xf32>
    %cst_22 = arith.constant dense<0.000000e+00> : vector<8x128xf32>
    %44 = tpu.matmul %38, %2, %cst_22 {dimension_numbers = #tpu.dot_dimension_numbers<[1], [0], [0], [1], [0, 0, 1, 1], [], []>} : vector<8x128xf32>, vector<128x128xf32>, vector<8x128xf32> -> vector<8x128xf32>
    %45 = arith.addf %43, %44 : vector<8x128xf32>
    %46 = math.tanh %45 : vector<8x128xf32>
    %c4 = arith.constant 4 : index
    %c0_23 = arith.constant 0 : index
    %c0_24 = arith.constant 0 : index
    %47 = vector.load %arg11[%c4, %c0_23, %c0_24] : memref<8x8x128xf32, #tpu.memory_space<vmem>>, vector<1x8x128xf32>
    %48 = vector.shape_cast %47 : vector<1x8x128xf32> to vector<8x128xf32>
    %49 = vector.shape_cast %46 : vector<8x128xf32> to vector<1x8x128xf32>
    tpu.vector_store %arg11[%c4, %c0_23, %c0_24], %49 {strides = array<i32>} : memref<8x8x128xf32, #tpu.memory_space<vmem>>, vector<1x8x128xf32>,
    %50 = vector.extract_strided_slice %8 {offsets = [5, 0, 0], sizes = [1, 8, 128], strides = [1, 1, 1]} : vector<8x8x128xf32> to vector<1x8x128xf32>
    %51 = vector.shape_cast %50 : vector<1x8x128xf32> to vector<8x128xf32>
    %cst_25 = arith.constant dense<0.000000e+00> : vector<8x128xf32>
    %52 = tpu.matmul %46, %2, %cst_25 {dimension_numbers = #tpu.dot_dimension_numbers<[1], [0], [0], [1], [0, 0, 1, 1], [], []>} : vector<8x128xf32>, vector<128x128xf32>, vector<8x128xf32> -> vector<8x128xf32>
    %53 = arith.addf %51, %52 : vector<8x128xf32>
    %54 = math.tanh %53 : vector<8x128xf32>
    %c5 = arith.constant 5 : index
    %c0_26 = arith.constant 0 : index
    %c0_27 = arith.constant 0 : index
    %55 = vector.load %arg11[%c5, %c0_26, %c0_27] : memref<8x8x128xf32, #tpu.memory_space<vmem>>, vector<1x8x128xf32>
    %56 = vector.shape_cast %55 : vector<1x8x128xf32> to vector<8x128xf32>
    %57 = vector.shape_cast %54 : vector<8x128xf32> to vector<1x8x128xf32>
    tpu.vector_store %arg11[%c5, %c0_26, %c0_27], %57 {strides = array<i32>} : memref<8x8x128xf32, #tpu.memory_space<vmem>>, vector<1x8x128xf32>,
    %58 = vector.extract_strided_slice %8 {offsets = [6, 0, 0], sizes = [1, 8, 128], strides = [1, 1, 1]} : vector<8x8x128xf32> to vector<1x8x128xf32>
    %59 = vector.shape_cast %58 : vector<1x8x128xf32> to vector<8x128xf32>
    %cst_28 = arith.constant dense<0.000000e+00> : vector<8x128xf32>
    %60 = tpu.matmul %54, %2, %cst_28 {dimension_numbers = #tpu.dot_dimension_numbers<[1], [0], [0], [1], [0, 0, 1, 1], [], []>} : vector<8x128xf32>, vector<128x128xf32>, vector<8x128xf32> -> vector<8x128xf32>
    %61 = arith.addf %59, %60 : vector<8x128xf32>
    %62 = math.tanh %61 : vector<8x128xf32>
    %c6 = arith.constant 6 : index
    %c0_29 = arith.constant 0 : index
    %c0_30 = arith.constant 0 : index
    %63 = vector.load %arg11[%c6, %c0_29, %c0_30] : memref<8x8x128xf32, #tpu.memory_space<vmem>>, vector<1x8x128xf32>
    %64 = vector.shape_cast %63 : vector<1x8x128xf32> to vector<8x128xf32>
    %65 = vector.shape_cast %62 : vector<8x128xf32> to vector<1x8x128xf32>
    tpu.vector_store %arg11[%c6, %c0_29, %c0_30], %65 {strides = array<i32>} : memref<8x8x128xf32, #tpu.memory_space<vmem>>, vector<1x8x128xf32>,
    %66 = vector.extract_strided_slice %8 {offsets = [7, 0, 0], sizes = [1, 8, 128], strides = [1, 1, 1]} : vector<8x8x128xf32> to vector<1x8x128xf32>
    %67 = vector.shape_cast %66 : vector<1x8x128xf32> to vector<8x128xf32>
    %cst_31 = arith.constant dense<0.000000e+00> : vector<8x128xf32>
    %68 = tpu.matmul %62, %2, %cst_31 {dimension_numbers = #tpu.dot_dimension_numbers<[1], [0], [0], [1], [0, 0, 1, 1], [], []>} : vector<8x128xf32>, vector<128x128xf32>, vector<8x128xf32> -> vector<8x128xf32>
    %69 = arith.addf %67, %68 : vector<8x128xf32>
    %70 = math.tanh %69 : vector<8x128xf32>
    %c7 = arith.constant 7 : index
    %c0_32 = arith.constant 0 : index
    %c0_33 = arith.constant 0 : index
    %71 = vector.load %arg11[%c7, %c0_32, %c0_33] : memref<8x8x128xf32, #tpu.memory_space<vmem>>, vector<1x8x128xf32>
    %72 = vector.shape_cast %71 : vector<1x8x128xf32> to vector<8x128xf32>
    %73 = vector.shape_cast %70 : vector<8x128xf32> to vector<1x8x128xf32>
    tpu.vector_store %arg11[%c7, %c0_32, %c0_33], %73 {strides = array<i32>} : memref<8x8x128xf32, #tpu.memory_space<vmem>>, vector<1x8x128xf32>,
    %c0_34 = arith.constant 0 : index
    %c0_35 = arith.constant 0 : index
    %c0_36 = arith.constant 0 : index
    %74 = vector.load %arg11[%c0_34, %c0_35, %c0_36] : memref<8x8x128xf32, #tpu.memory_space<vmem>>, vector<8x8x128xf32>
    %c0_37 = arith.constant 0 : index
    %c0_38 = arith.constant 0 : index
    %75 = vector.load %arg3[%c0_37, %c0_38] : memref<128x128xf32, #tpu.memory_space<vmem>>, vector<128x128xf32>
    %c0_39 = arith.constant 0 : index
    %c0_40 = arith.constant 0 : index
    %76 = vector.load %arg5[%c0_39, %c0_40] : memref<128x128xf32, #tpu.memory_space<vmem>>, vector<128x128xf32>
    %77 = vector.shape_cast %74 : vector<8x8x128xf32> to vector<64x128xf32>
    %cst_41 = arith.constant dense<0.000000e+00> : vector<64x128xf32>
    %78 = tpu.matmul %77, %75, %cst_41 {dimension_numbers = #tpu.dot_dimension_numbers<[1], [0], [0], [1], [0, 0, 1, 1], [], []>} : vector<64x128xf32>, vector<128x128xf32>, vector<64x128xf32> -> vector<64x128xf32>
    %c0_42 = arith.constant 0 : index
    %c0_43 = arith.constant 0 : index
    %79 = vector.load %arg7[%c0_42, %c0_43] : memref<1x128xf32, #tpu.memory_space<vmem>>, vector<1x128xf32>
    %80 = vector.broadcast %79 : vector<1x128xf32> to vector<64x128xf32>
    %81 = arith.addf %78, %80 : vector<64x128xf32>
    %82 = vector.shape_cast %81 : vector<64x128xf32> to vector<8x8x128xf32>
    %cst_44 = arith.constant 0.000000e+00 : f32
    %83 = vector.broadcast %cst_44 : f32 to vector<8x128xf32>
    %84 = vector.extract_strided_slice %82 {offsets = [0, 0, 0], sizes = [1, 8, 128], strides = [1, 1, 1]} : vector<8x8x128xf32> to vector<1x8x128xf32>
    %85 = vector.shape_cast %84 : vector<1x8x128xf32> to vector<8x128xf32>
    %cst_45 = arith.constant dense<0.000000e+00> : vector<8x128xf32>
    %86 = tpu.matmul %83, %76, %cst_45 {dimension_numbers = #tpu.dot_dimension_numbers<[1], [0], [0], [1], [0, 0, 1, 1], [], []>} : vector<8x128xf32>, vector<128x128xf32>, vector<8x128xf32> -> vector<8x128xf32>
    %87 = arith.addf %85, %86 : vector<8x128xf32>
    %88 = math.tanh %87 : vector<8x128xf32>
    %89 = vector.extract_strided_slice %82 {offsets = [1, 0, 0], sizes = [1, 8, 128], strides = [1, 1, 1]} : vector<8x8x128xf32> to vector<1x8x128xf32>
    %90 = vector.shape_cast %89 : vector<1x8x128xf32> to vector<8x128xf32>
    %cst_46 = arith.constant dense<0.000000e+00> : vector<8x128xf32>
    %91 = tpu.matmul %88, %76, %cst_46 {dimension_numbers = #tpu.dot_dimension_numbers<[1], [0], [0], [1], [0, 0, 1, 1], [], []>} : vector<8x128xf32>, vector<128x128xf32>, vector<8x128xf32> -> vector<8x128xf32>
    %92 = arith.addf %90, %91 : vector<8x128xf32>
    %93 = math.tanh %92 : vector<8x128xf32>
    %94 = vector.extract_strided_slice %82 {offsets = [2, 0, 0], sizes = [1, 8, 128], strides = [1, 1, 1]} : vector<8x8x128xf32> to vector<1x8x128xf32>
    %95 = vector.shape_cast %94 : vector<1x8x128xf32> to vector<8x128xf32>
    %cst_47 = arith.constant dense<0.000000e+00> : vector<8x128xf32>
    %96 = tpu.matmul %93, %76, %cst_47 {dimension_numbers = #tpu.dot_dimension_numbers<[1], [0], [0], [1], [0, 0, 1, 1], [], []>} : vector<8x128xf32>, vector<128x128xf32>, vector<8x128xf32> -> vector<8x128xf32>
    %97 = arith.addf %95, %96 : vector<8x128xf32>
    %98 = math.tanh %97 : vector<8x128xf32>
    %99 = vector.extract_strided_slice %82 {offsets = [3, 0, 0], sizes = [1, 8, 128], strides = [1, 1, 1]} : vector<8x8x128xf32> to vector<1x8x128xf32>
    %100 = vector.shape_cast %99 : vector<1x8x128xf32> to vector<8x128xf32>
    %cst_48 = arith.constant dense<0.000000e+00> : vector<8x128xf32>
    %101 = tpu.matmul %98, %76, %cst_48 {dimension_numbers = #tpu.dot_dimension_numbers<[1], [0], [0], [1], [0, 0, 1, 1], [], []>} : vector<8x128xf32>, vector<128x128xf32>, vector<8x128xf32> -> vector<8x128xf32>
    %102 = arith.addf %100, %101 : vector<8x128xf32>
    %103 = math.tanh %102 : vector<8x128xf32>
    %104 = vector.extract_strided_slice %82 {offsets = [4, 0, 0], sizes = [1, 8, 128], strides = [1, 1, 1]} : vector<8x8x128xf32> to vector<1x8x128xf32>
    %105 = vector.shape_cast %104 : vector<1x8x128xf32> to vector<8x128xf32>
    %cst_49 = arith.constant dense<0.000000e+00> : vector<8x128xf32>
    %106 = tpu.matmul %103, %76, %cst_49 {dimension_numbers = #tpu.dot_dimension_numbers<[1], [0], [0], [1], [0, 0, 1, 1], [], []>} : vector<8x128xf32>, vector<128x128xf32>, vector<8x128xf32> -> vector<8x128xf32>
    %107 = arith.addf %105, %106 : vector<8x128xf32>
    %108 = math.tanh %107 : vector<8x128xf32>
    %109 = vector.extract_strided_slice %82 {offsets = [5, 0, 0], sizes = [1, 8, 128], strides = [1, 1, 1]} : vector<8x8x128xf32> to vector<1x8x128xf32>
    %110 = vector.shape_cast %109 : vector<1x8x128xf32> to vector<8x128xf32>
    %cst_50 = arith.constant dense<0.000000e+00> : vector<8x128xf32>
    %111 = tpu.matmul %108, %76, %cst_50 {dimension_numbers = #tpu.dot_dimension_numbers<[1], [0], [0], [1], [0, 0, 1, 1], [], []>} : vector<8x128xf32>, vector<128x128xf32>, vector<8x128xf32> -> vector<8x128xf32>
    %112 = arith.addf %110, %111 : vector<8x128xf32>
    %113 = math.tanh %112 : vector<8x128xf32>
    %114 = vector.extract_strided_slice %82 {offsets = [6, 0, 0], sizes = [1, 8, 128], strides = [1, 1, 1]} : vector<8x8x128xf32> to vector<1x8x128xf32>
    %115 = vector.shape_cast %114 : vector<1x8x128xf32> to vector<8x128xf32>
    %cst_51 = arith.constant dense<0.000000e+00> : vector<8x128xf32>
    %116 = tpu.matmul %113, %76, %cst_51 {dimension_numbers = #tpu.dot_dimension_numbers<[1], [0], [0], [1], [0, 0, 1, 1], [], []>} : vector<8x128xf32>, vector<128x128xf32>, vector<8x128xf32> -> vector<8x128xf32>
    %117 = arith.addf %115, %116 : vector<8x128xf32>
    %118 = math.tanh %117 : vector<8x128xf32>
    %119 = vector.extract_strided_slice %82 {offsets = [7, 0, 0], sizes = [1, 8, 128], strides = [1, 1, 1]} : vector<8x8x128xf32> to vector<1x8x128xf32>
    %120 = vector.shape_cast %119 : vector<1x8x128xf32> to vector<8x128xf32>
    %cst_52 = arith.constant dense<0.000000e+00> : vector<8x128xf32>
    %121 = tpu.matmul %118, %76, %cst_52 {dimension_numbers = #tpu.dot_dimension_numbers<[1], [0], [0], [1], [0, 0, 1, 1], [], []>} : vector<8x128xf32>, vector<128x128xf32>, vector<8x128xf32> -> vector<8x128xf32>
    %122 = arith.addf %120, %121 : vector<8x128xf32>
    %123 = math.tanh %122 : vector<8x128xf32>
    %c0_53 = arith.constant 0 : index
    %c0_54 = arith.constant 0 : index
    %124 = vector.load %arg8[%c0_53, %c0_54] : memref<128x128xf32, #tpu.memory_space<vmem>>, vector<128x128xf32>
    %cst_55 = arith.constant dense<0.000000e+00> : vector<8x128xf32>
    %125 = tpu.matmul %123, %124, %cst_55 {dimension_numbers = #tpu.dot_dimension_numbers<[1], [0], [0], [1], [0, 0, 1, 1], [], []>} : vector<8x128xf32>, vector<128x128xf32>, vector<8x128xf32> -> vector<8x128xf32>
    %c0_56 = arith.constant 0 : index
    %c0_57 = arith.constant 0 : index
    %126 = vector.load %arg9[%c0_56, %c0_57] : memref<1x128xf32, #tpu.memory_space<vmem>>, vector<1x128xf32>
    %127 = vector.broadcast %126 : vector<1x128xf32> to vector<8x128xf32>
    %128 = arith.addf %125, %127 : vector<8x128xf32>
    %c0_58 = arith.constant 0 : index
    %c0_59 = arith.constant 0 : index
    %129 = vector.load %arg10[%c0_58, %c0_59] : memref<8x128xf32, #tpu.memory_space<vmem>>, vector<8x128xf32>
    tpu.vector_store %arg10[%c0_58, %c0_59], %128 {strides = array<i32>} : memref<8x128xf32, #tpu.memory_space<vmem>>, vector<8x128xf32>,
    return
  }
  func.func @transform_0(%arg0: i32) -> (i32, i32, i32) {
    %c0_i32 = arith.constant 0 : i32
    %c0_i32_0 = arith.constant 0 : i32
    %c0_i32_1 = arith.constant 0 : i32
    return %c0_i32, %arg0, %c0_i32_0 : i32, i32, i32
  }
  func.func @transform_1(%arg0: i32) -> (i32, i32) {
    %c0_i32 = arith.constant 0 : i32
    %c0_i32_0 = arith.constant 0 : i32
    %c0_i32_1 = arith.constant 0 : i32
    return %c0_i32, %c0_i32_0 : i32, i32
  }
  func.func @transform_2(%arg0: i32) -> (i32, i32) {
    %c0_i32 = arith.constant 0 : i32
    %c0_i32_0 = arith.constant 0 : i32
    %c0_i32_1 = arith.constant 0 : i32
    return %c0_i32, %c0_i32_0 : i32, i32
  }
  func.func @transform_3(%arg0: i32) -> (i32, i32) {
    %c0_i32 = arith.constant 0 : i32
    %c0_i32_0 = arith.constant 0 : i32
    %c0_i32_1 = arith.constant 0 : i32
    return %c0_i32, %c0_i32_0 : i32, i32
  }
  func.func @transform_4(%arg0: i32) -> (i32, i32) {
    %c0_i32 = arith.constant 0 : i32
    %c0_i32_0 = arith.constant 0 : i32
    %c0_i32_1 = arith.constant 0 : i32
    return %c0_i32, %c0_i32_0 : i32, i32
  }
  func.func @transform_5(%arg0: i32) -> (i32, i32) {
    %c0_i32 = arith.constant 0 : i32
    %c0_i32_0 = arith.constant 0 : i32
    %c0_i32_1 = arith.constant 0 : i32
    return %c0_i32, %c0_i32_0 : i32, i32
  }
  func.func @transform_6(%arg0: i32) -> (i32, i32) {
    %c0_i32 = arith.constant 0 : i32
    %c0_i32_0 = arith.constant 0 : i32
    %c0_i32_1 = arith.constant 0 : i32
    return %c0_i32, %c0_i32_0 : i32, i32
  }
  func.func @transform_7(%arg0: i32) -> (i32, i32) {
    %c0_i32 = arith.constant 0 : i32
    %c0_i32_0 = arith.constant 0 : i32
    %c0_i32_1 = arith.constant 0 : i32
    return %c0_i32, %c0_i32_0 : i32, i32
  }
  func.func @transform_8(%arg0: i32) -> (i32, i32) {
    %c0_i32 = arith.constant 0 : i32
    %c0_i32_0 = arith.constant 0 : i32
    %c0_i32_1 = arith.constant 0 : i32
    return %c0_i32, %c0_i32_0 : i32, i32
  }
  func.func @transform_9(%arg0: i32) -> (i32, i32) {
    %c0_i32 = arith.constant 0 : i32
    %c0_i32_0 = arith.constant 0 : i32
    return %arg0, %c0_i32 : i32, i32
  }
}

</mosaic_0001>

<bundles_post_ra>
// kernel: tpu_custom_call.1
= control target key start
LH: loop header
LB: loop body
LE: loop exit
PB: predicated region body
PF: predicated region fallthrough
CT: control target
= control target key end

     0   :  { %14 = vsyncpa [#allocation4], 0  ;;  %s3721_s0 = inlined_call_operand.hbm [shape: f32[8,8,128], index: 0, kind: input, shape index: {}]   ;;  %s3722_s1 = inlined_call_operand.hbm [shape: f32[128,128], index: 1, kind: input, shape index: {}]   ;;  %s3723_s2 = inlined_call_operand.hbm [shape: f32[128,128], index: 2, kind: input, shape index: {}]   ;;  %s3724_s3 = inlined_call_operand.hbm [shape: f32[128,128], index: 3, kind: input, shape index: {}]   ;;  %s3725_s4 = inlined_call_operand.hbm [shape: f32[128,128], index: 4, kind: input, shape index: {}]   ;;  %s3726_s5 = inlined_call_operand.vmem [shape: f32[1,128], index: 5, kind: input, shape index: {}]   ;;  %s3727_s6 = inlined_call_operand.vmem [shape: f32[1,128], index: 6, kind: input, shape index: {}]   ;;  %s3728_s7 = inlined_call_operand.hbm [shape: f32[128,128], index: 7, kind: input, shape index: {}]   ;;  %s3729_s8 = inlined_call_operand.vmem [shape: f32[1,128], index: 8, kind: input, shape index: {}]   ;;  %s3730_s9 = inlined_call_operand.hbm [shape: f32[8,128], index: 9, kind: output, shape index: {}]  }
   0x1   :  { %15 = vsyncpa [#allocation7], 0 }
   0x2   :  { %16 = vsyncpa [#allocation10], 0 }
   0x3   :  { %17 = vsyncpa [#allocation13], 0 }
   0x4   :  { %18 = vsyncpa [#allocation5], 0  ;;  %s2914_s30 = smov [#allocation6]   ;;  %s2915_s11 = smov [#allocation9]  }
   0x5   :  { %s36_s10 = sshll.u32 %s2914_s30, 4  ;;  %s60_s12 = sshll.u32 %s2915_s11, 4  ;;  %s37_s10 = int_to_ptr.vmem [resolvable:$true] %s36_s10  ;;  %s61_s12 = int_to_ptr.vmem [resolvable:$true] %s60_s12 }
   0x6   :  { %s2772_s13 = scalar_lea.vmem %s37_s10, 2048  ;;  %p2777_p1 = scmp.lt.s32.totalorder %s37_s10, %s37_s10 }
   0x7   :  { %p2773_p0 = scmp.ne.s32.totalorder %s37_s10, %s2772_s13  ;;  %p2778_p2 = scmp.lt.s32.totalorder %s2772_s13, %s2772_s13 }
   0x9   :  { %p2779_p3 = por %p2778_p2, %p2777_p1 }
   0xb   :  { %p2780_p4 = pnand %p2779_p3, %p2773_p0 }
   0xd   :  { %2783 = shalt.err (!%p2780_p4)
}
   0xe   :  { %s2916_s14 = smov 128   ;;  %s2917_s15 = smov 8  }
   0xf   :  { %42 = dma.hbm_to_vmem [thread:$0]  %s3722_s1, 2048, %s37_s10, [#allocation7], %s2916_s14, %s2916_s14, %s2917_s15  }
  0x10   :  { %s2792_s18 = scalar_lea.vmem %s61_s12, 2048  ;;  %p2797_p6 = scmp.lt.s32.totalorder %s61_s12, %s61_s12 }
  0x11   :  { %p2793_p5 = scmp.ne.s32.totalorder %s61_s12, %s2792_s18  ;;  %p2798_p7 = scmp.lt.s32.totalorder %s2792_s18, %s2792_s18 }
  0x13   :  { %p2799_p8 = por %p2798_p7, %p2797_p6 }
  0x15   :  { %p2800_p9 = pnand %p2799_p8, %p2793_p5 }
  0x17   :  { %2803 = shalt.err (!%p2800_p9)
}
  0x18   :  { %66 = dma.hbm_to_vmem [thread:$0]  %s3724_s3, 2048, %s61_s12, [#allocation10], %s2916_s14, %s2916_s14, %s2917_s15  }
  0x19   :  { %s2918_s21 = smov [#allocation3]   ;;  %s2919_s23 = smov [#allocation8]  }
  0x1a   :  { %s24_s22 = sshll.u32 %s2918_s21, 4  ;;  %s48_s24 = sshll.u32 %s2919_s23, 4  ;;  %s25_s22 = int_to_ptr.vmem [resolvable:$true] %s24_s22  ;;  %s49_s24 = int_to_ptr.vmem [resolvable:$true] %s48_s24 }
  0x1b   :  { %s2812_s1 = scalar_lea.vmem %s25_s22, 1024  ;;  %p2817_p11 = scmp.lt.s32.totalorder %s25_s22, %s25_s22 }
  0x1c   :  { %p2813_p10 = scmp.ne.s32.totalorder %s25_s22, %s2812_s1  ;;  %p2818_p12 = scmp.lt.s32.totalorder %s2812_s1, %s2812_s1 }
  0x1e   :  { %p2819_p13 = por %p2818_p12, %p2817_p11 }
  0x20   :  { %p2820_p0 = pnand %p2819_p13, %p2813_p10 }
  0x22   :  { %2823 = shalt.err (!%p2820_p0)
}
  0x23   :  { %30 = dma.hbm_to_vmem [thread:$0]  %s3721_s0, 1024, %s25_s22, [#allocation4], %s2916_s14, %s2916_s14, %s2917_s15  }
  0x24   :  { %s2832_s3 = scalar_lea.vmem %s49_s24, 2048  ;;  %p2837_p2 = scmp.lt.s32.totalorder %s49_s24, %s49_s24 }
  0x25   :  { %p2833_p1 = scmp.ne.s32.totalorder %s49_s24, %s2832_s3  ;;  %p2838_p3 = scmp.lt.s32.totalorder %s2832_s3, %s2832_s3 }
  0x27   :  { %p2839_p4 = por %p2838_p3, %p2837_p2 }
  0x29   :  { %p2840_p5 = pnand %p2839_p4, %p2833_p1 }
  0x2b   :  { %2843 = shalt.err (!%p2840_p5)
}
  0x2c   :  { %54 = dma.hbm_to_vmem [thread:$0]  %s3723_s2, 2048, %s49_s24, [#allocation7], %s2916_s14, %s2916_s14, %s2917_s15  }
  0x2d   :  { %s2920_s29 = smov [#allocation11]   ;;  %s2921_s10 = smov [#allocation12]  }
  0x2e   :  { %s72_s30 = sshll.u32 %s2920_s29, 4  ;;  %s88_s11 = sshll.u32 %s2921_s10, 4  ;;  %s73_s30 = int_to_ptr.vmem [resolvable:$true] %s72_s30  ;;  %s89_s11 = int_to_ptr.vmem [resolvable:$true] %s88_s11 }
  0x2f   :  { %s2852_s0 = scalar_lea.vmem %s73_s30, 2048  ;;  %p2857_p7 = scmp.lt.s32.totalorder %s73_s30, %s73_s30 }
  0x30   :  { %p2853_p6 = scmp.ne.s32.totalorder %s73_s30, %s2852_s0  ;;  %p2858_p8 = scmp.lt.s32.totalorder %s2852_s0, %s2852_s0 }
  0x32   :  { %p2859_p9 = por %p2858_p8, %p2857_p7 }
  0x34   :  { %p2860_p10 = pnand %p2859_p9, %p2853_p6 }
  0x36   :  { %2863 = shalt.err (!%p2860_p10)
}
  0x37   :  { %78 = dma.hbm_to_vmem [thread:$0]  %s3725_s4, 2048, %s73_s30, [#allocation10], %s2916_s14, %s2916_s14, %s2917_s15  }
  0x38   :  { %s2872_s2 = scalar_lea.vmem %s89_s11, 2048  ;;  %p2877_p12 = scmp.lt.s32.totalorder %s89_s11, %s89_s11 }
  0x39   :  { %p2873_p11 = scmp.ne.s32.totalorder %s89_s11, %s2872_s2  ;;  %p2878_p13 = scmp.lt.s32.totalorder %s2872_s2, %s2872_s2 }
  0x3b   :  { %p2879_p0 = por %p2878_p13, %p2877_p12 }
  0x3d   :  { %p2880_p1 = pnand %p2879_p0, %p2873_p11 }
  0x3f   :  { %2883 = shalt.err (!%p2880_p1)
}
  0x40   :  { %94 = dma.hbm_to_vmem [thread:$0]  %s3728_s7, 2048, %s89_s11, [#allocation13], %s2916_s14, %s2916_s14, %s2917_s15  }
  0x41   :  { %2904 = dma.done.wait [#allocation4], 1024  }
  0x42   :  { %2905 = vsyncadd [#allocation4], 4294966272 }
  0x43   :  { %2906 = dma.done.wait [#allocation7], 4096  }
  0x44   :  { %2907 = vsyncadd [#allocation7], 4294963200 }
  0x45   :  { %2908 = dma.done.wait [#allocation10], 4096  }
  0x46   :  { %2909 = vsyncadd [#allocation10], 4294963200 }
  0x47   :  { %2910 = dma.done.wait [#allocation13], 2048  }
  0x48   :  { %2911 = vsyncadd [#allocation13], 4294965248  ;;  %v2922_v0 = vmov 0.0   ;;  %vm2923_vm0 = vmmov 0   ;;  %v138_v1 = vld [vmem:[#allocation6 + $0x78] sm:$0xff]  ;;  %v137_v2 = vld [vmem:[#allocation6 + $0x70] sm:$0xff] }
  0x49   :  { %2082 = vmatprep.subr.mxu1 %v2922_v0  ;;  %2114 = vmatprep.mubr.msk.f32.mxu1 %vm2923_vm0, %v2922_v0  ;;  %v3014_v3 = vld [vmem:[#allocation9 + $0x78] sm:$0xff]  ;;  %v3017_v4 = vld [vmem:[#allocation9 + $0x70] sm:$0xff]  ;;  %v136_v5 = vld [vmem:[#allocation6 + $0x68] sm:$0xff]  ;;  %s2924_s18 = smov [#allocation14]  }
  0x4a   :  { %2038 = vmatprep.subr.mxu0 %v138_v1  ;;  %2083 = vmatpush3.msra.mxu1 %v3014_v3  ;;  %v3020_v6 = vld [vmem:[#allocation9 + $0x68] sm:$0xff]  ;;  %v135_v7 = vld [vmem:[#allocation6 + $0x60] sm:$0xff]  ;;  %v134_v9 = vld [vmem:[#allocation6 + $0x58] sm:$0xff]  ;;  %s1686_s19 = sshll.u32 %s2924_s18, 4  ;;  %s1687_s19 = int_to_ptr.vmem [resolvable:$true] %s1686_s19 }
  0x4b   :  { %2039 = vmatpush3.msra.mxu0 %v138_v1  ;;  %2084 = vmatprep.subr.mxu1 %v2922_v0  ;;  %v3024_v8 = vld [vmem:[#allocation9 + $0x60] sm:$0xff]  ;;  %v3028_v10 = vld [vmem:[#allocation9 + $0x58] sm:$0xff]  ;;  %v133_v11 = vld [vmem:[#allocation6 + $0x50] sm:$0xff]  ;;  %s2884_s20 = scalar_lea.vmem %s1687_s19, 128  ;;  %p2889_p3 = scmp.lt.s32.totalorder %s1687_s19, %s1687_s19 }
  0x4c   :  { %2040 = vmatprep.subr.mxu0 %v137_v2  ;;  %2085 = vmatpush3.msra.mxu1 %v3017_v4  ;;  %v3032_v12 = vld [vmem:[#allocation9 + $0x50] sm:$0xff]  ;;  %v132_v13 = vld [vmem:[#allocation6 + $0x48] sm:$0xff]  ;;  %v131_v15 = vld [vmem:[#allocation6 + $0x40] sm:$0xff]  ;;  %p2885_p2 = scmp.ne.s32.totalorder %s1687_s19, %s2884_s20  ;;  %p2890_p4 = scmp.lt.s32.totalorder %s2884_s20, %s2884_s20 }
  0x4d   :  { %2041 = vmatpush3.msra.mxu0 %v137_v2  ;;  %2086 = vmatprep.subr.mxu1 %v2922_v0  ;;  %v3036_v14 = vld [vmem:[#allocation9 + $0x48] sm:$0xff]  ;;  %v3040_v16 = vld [vmem:[#allocation9 + $0x40] sm:$0xff]  ;;  %v130_v17 = vld [vmem:[#allocation6 + $0x38] sm:$0xff] }
  0x4e   :  { %2042 = vmatprep.subr.mxu0 %v136_v5  ;;  %2087 = vmatpush3.msra.mxu1 %v3020_v6  ;;  %v3044_v18 = vld [vmem:[#allocation9 + $0x38] sm:$0xff]  ;;  %v129_v19 = vld [vmem:[#allocation6 + $0x30] sm:$0xff]  ;;  %v128_v21 = vld [vmem:[#allocation6 + $0x28] sm:$0xff]  ;;  %p2891_p5 = por %p2890_p4, %p2889_p3 }
  0x4f   :  { %2043 = vmatpush3.msra.mxu0 %v136_v5  ;;  %2088 = vmatprep.subr.mxu1 %v2922_v0  ;;  %v3048_v20 = vld [vmem:[#allocation9 + $0x30] sm:$0xff]  ;;  %v3052_v22 = vld [vmem:[#allocation9 + $0x28] sm:$0xff]  ;;  %v127_v23 = vld [vmem:[#allocation6 + $0x20] sm:$0xff] }
  0x50   :  { %2044 = vmatprep.subr.mxu0 %v135_v7  ;;  %2089 = vmatpush3.msra.mxu1 %v3024_v8  ;;  %v3056_v24 = vld [vmem:[#allocation9 + $0x20] sm:$0xff]  ;;  %v126_v25 = vld [vmem:[#allocation6 + $0x18] sm:$0xff]  ;;  %v125_v27 = vld [vmem:[#allocation6 + $0x10] sm:$0xff]  ;;  %p2892_p6 = pnand %p2891_p5, %p2885_p2 }
  0x51   :  { %2045 = vmatpush3.msra.mxu0 %v135_v7  ;;  %2090 = vmatprep.subr.mxu1 %v2922_v0  ;;  %v3060_v26 = vld [vmem:[#allocation9 + $0x18] sm:$0xff]  ;;  %v3064_v28 = vld [vmem:[#allocation9 + $0x10] sm:$0xff]  ;;  %v124_v29 = vld [vmem:[#allocation6 + $0x8] sm:$0xff] }
  0x52   :  { %2046 = vmatprep.subr.mxu0 %v134_v9  ;;  %2091 = vmatpush3.msra.mxu1 %v3028_v10  ;;  %v115_v30 = vld [vmem:[#allocation3] sm:$0xff]  ;;  %v3069_v31 = vld [vmem:[#allocation9 + $0x8] sm:$0xff]  ;;  %v117_v35 = vld [vmem:[#allocation3 + $0x10] sm:$0xff] }
  0x53   :  { %2047 = vmatpush3.msra.mxu0 %v134_v9  ;;  %2092 = vmatprep.subr.mxu1 %v2922_v0  ;;  %v123_v32 = vld [vmem:[#allocation6] sm:$0xff]  ;;  %v116_v34 = vld [vmem:[#allocation3 + $0x8] sm:$0xff]  ;;  %v118_v36 = vld [vmem:[#allocation3 + $0x18] sm:$0xff] }
  0x54   :  { %2048 = vmatprep.subr.mxu0 %v133_v11  ;;  %2093 = vmatpush3.msra.mxu1 %v3032_v12  ;;  %v3072_v33 = vld [vmem:[#allocation9] sm:$0xff]  ;;  %v120_v38 = vld [vmem:[#allocation3 + $0x28] sm:$0xff]  ;;  %v121_v39 = vld [vmem:[#allocation3 + $0x30] sm:$0xff] }
  0x55   :  { %2049 = vmatpush3.msra.mxu0 %v133_v11  ;;  %2094 = vmatprep.subr.mxu1 %v2922_v0  ;;  %v119_v37 = vld [vmem:[#allocation3 + $0x20] sm:$0xff]  ;;  %v122_v40 = vld [vmem:[#allocation3 + $0x38] sm:$0xff] }
  0x56   :  { %2050 = vmatprep.subr.mxu0 %v132_v13  ;;  %2095 = vmatpush3.msra.mxu1 %v3036_v14  ;;  %v3151_v43 = vld [vmem:[%s3726_s5] ss:$0 sm:$0xff] }
  0x57   :  { %2051 = vmatpush3.msra.mxu0 %v132_v13  ;;  %2096 = vmatprep.subr.mxu1 %v2922_v0 }
  0x58   :  { %2052 = vmatprep.subr.mxu0 %v131_v15  ;;  %2097 = vmatpush3.msra.mxu1 %v3040_v16 }
  0x59   :  { %2053 = vmatpush3.msra.mxu0 %v131_v15  ;;  %2098 = vmatprep.subr.mxu1 %v2922_v0 }
  0x5a   :  { %2054 = vmatprep.subr.mxu0 %v130_v17  ;;  %2099 = vmatpush3.msra.mxu1 %v3044_v18 }
  0x5b   :  { %2055 = vmatpush3.msra.mxu0 %v130_v17  ;;  %2100 = vmatprep.subr.mxu1 %v2922_v0 }
  0x5c   :  { %2056 = vmatprep.subr.mxu0 %v129_v19  ;;  %2101 = vmatpush3.msra.mxu1 %v3048_v20 }
  0x5d   :  { %2057 = vmatpush3.msra.mxu0 %v129_v19  ;;  %2102 = vmatprep.subr.mxu1 %v2922_v0 }
  0x5e   :  { %2058 = vmatprep.subr.mxu0 %v128_v21  ;;  %2103 = vmatpush3.msra.mxu1 %v3052_v22 }
  0x5f   :  { %2059 = vmatpush3.msra.mxu0 %v128_v21  ;;  %2104 = vmatprep.subr.mxu1 %v2922_v0 }
  0x60   :  { %2060 = vmatprep.subr.mxu0 %v127_v23  ;;  %2105 = vmatpush3.msra.mxu1 %v3056_v24 }
  0x61   :  { %2061 = vmatpush3.msra.mxu0 %v127_v23  ;;  %2106 = vmatprep.subr.mxu1 %v2922_v0  ;;  %v875_v23 = vld [vmem:[#allocation8 + $0x48] sm:$0xff] }
  0x62   :  { %2062 = vmatprep.subr.mxu0 %v126_v25  ;;  %2107 = vmatpush3.msra.mxu1 %v3060_v26 }
  0x63   :  { %2063 = vmatpush3.msra.mxu0 %v126_v25  ;;  %2108 = vmatprep.subr.mxu1 %v2922_v0  ;;  %v873_v25 = vld [vmem:[#allocation8 + $0x38] sm:$0xff] }
  0x64   :  { %2064 = vmatprep.subr.mxu0 %v125_v27  ;;  %2109 = vmatpush3.msra.mxu1 %v3064_v28 }
  0x65   :  { %2065 = vmatpush3.msra.mxu0 %v125_v27  ;;  %2110 = vmatprep.subr.mxu1 %v2922_v0  ;;  %v871_v27 = vld [vmem:[#allocation8 + $0x28] sm:$0xff] }
  0x66   :  { %2066 = vmatprep.subr.mxu0 %v124_v29  ;;  %2070 = vmatprep.mubr.f32.mxu0 %v115_v30  ;;  %v868_v30 = vld [vmem:[#allocation8 + $0x10] sm:$0xff] }
  0x67   :  { %2067 = vmatpush3.msra.mxu0 %v124_v29  ;;  %2111 = vmatpush3.msra.mxu1 %v3069_v31  ;;  %v869_v29 = vld [vmem:[#allocation8 + $0x18] sm:$0xff] }
  0x68   :  { %2068 = vmatprep.subr.mxu0 %v123_v32  ;;  %2112 = vmatprep.subr.mxu1 %v2922_v0 }
  0x69   :  { %2069 = vmatpush3.msra.mxu0 %v123_v32  ;;  %2113 = vmatpush3.msra.mxu1 %v3072_v33  ;;  %v866_v32 = vld [vmem:[#allocation8] sm:$0xff] }
  0x6a   :  { %2071 = vmatmul.mubr.f32.vlgmr.msra.gmra.mxu0 %v116_v34  ;;  %2115 = vmatmul.mubr.f32.vlgmr.msra.gmra.mxu1 %v2922_v0  ;;  %v3365_v34 = vld [vmem:[#allocation11 + $0x70] sm:$0xff] }
  0x6b   :  { %2117 = vmatprep.subr.mxu0 %v2922_v0  ;;  %2152 = vmatprep.subr.mxu1 %v2922_v0 }
  0x6c   :  { %2118 = vmatpush3.msra.mxu0 %v3014_v3  ;;  %2153 = vmatpush3.msra.mxu1 %v3014_v3 }
  0x6d   :  { %2119 = vmatprep.subr.mxu0 %v2922_v0  ;;  %2154 = vmatprep.subr.mxu1 %v2922_v0 }
  0x6e   :  { %2120 = vmatpush3.msra.mxu0 %v3017_v4  ;;  %2155 = vmatpush3.msra.mxu1 %v3017_v4 }
  0x6f   :  { %2121 = vmatprep.subr.mxu0 %v2922_v0  ;;  %2156 = vmatprep.subr.mxu1 %v2922_v0 }
  0x70   :  { %2122 = vmatpush3.msra.mxu0 %v3020_v6  ;;  %2157 = vmatpush3.msra.mxu1 %v3020_v6 }
  0x71   :  { %2123 = vmatprep.subr.mxu0 %v2922_v0  ;;  %2158 = vmatprep.subr.mxu1 %v2922_v0 }
  0x72   :  { %2124 = vmatpush3.msra.mxu0 %v3024_v8  ;;  %2159 = vmatpush3.msra.mxu1 %v3024_v8 }
  0x73   :  { %2125 = vmatprep.subr.mxu0 %v2922_v0  ;;  %2160 = vmatprep.subr.mxu1 %v2922_v0 }
  0x74   :  { %2126 = vmatpush3.msra.mxu0 %v3028_v10  ;;  %2161 = vmatpush3.msra.mxu1 %v3028_v10 }
  0x75   :  { %2127 = vmatprep.subr.mxu0 %v2922_v0  ;;  %2162 = vmatprep.subr.mxu1 %v2922_v0 }
  0x76   :  { %2128 = vmatpush3.msra.mxu0 %v3032_v12  ;;  %2163 = vmatpush3.msra.mxu1 %v3032_v12 }
  0x77   :  { %2129 = vmatprep.subr.mxu0 %v2922_v0  ;;  %2164 = vmatprep.subr.mxu1 %v2922_v0 }
  0x78   :  { %2130 = vmatpush3.msra.mxu0 %v3036_v14  ;;  %2165 = vmatpush3.msra.mxu1 %v3036_v14 }
  0x79   :  { %2131 = vmatprep.subr.mxu0 %v2922_v0  ;;  %2166 = vmatprep.subr.mxu1 %v2922_v0 }
  0x7a   :  { %2132 = vmatpush3.msra.mxu0 %v3040_v16  ;;  %2167 = vmatpush3.msra.mxu1 %v3040_v16 }
  0x7b   :  { %2133 = vmatprep.subr.mxu0 %v2922_v0  ;;  %2168 = vmatprep.subr.mxu1 %v2922_v0 }
  0x7c   :  { %2134 = vmatpush3.msra.mxu0 %v3044_v18  ;;  %2169 = vmatpush3.msra.mxu1 %v3044_v18 }
  0x7d   :  { %2135 = vmatprep.subr.mxu0 %v2922_v0  ;;  %2170 = vmatprep.subr.mxu1 %v2922_v0 }
  0x7e   :  { %2136 = vmatpush3.msra.mxu0 %v3048_v20  ;;  %2171 = vmatpush3.msra.mxu1 %v3048_v20 }
  0x7f   :  { %2137 = vmatprep.subr.mxu0 %v2922_v0  ;;  %2172 = vmatprep.subr.mxu1 %v2922_v0 }
  0x80   :  { %2138 = vmatpush3.msra.mxu0 %v3052_v22  ;;  %2173 = vmatpush3.msra.mxu1 %v3052_v22 }
  0x81   :  { %2139 = vmatprep.subr.mxu0 %v2922_v0  ;;  %2174 = vmatprep.subr.mxu1 %v2922_v0 }
  0x82   :  { %2140 = vmatpush3.msra.mxu0 %v3056_v24  ;;  %2175 = vmatpush3.msra.mxu1 %v3056_v24 }
  0x83   :  { %2141 = vmatprep.subr.mxu0 %v2922_v0  ;;  %2176 = vmatprep.subr.mxu1 %v2922_v0 }
  0x84   :  { %2142 = vmatpush3.msra.mxu0 %v3060_v26  ;;  %2177 = vmatpush3.msra.mxu1 %v3060_v26 }
  0x85   :  { %2143 = vmatprep.subr.mxu0 %v2922_v0  ;;  %2178 = vmatprep.subr.mxu1 %v2922_v0 }
  0x86   :  { %2144 = vmatpush3.msra.mxu0 %v3064_v28  ;;  %2179 = vmatpush3.msra.mxu1 %v3064_v28 }
  0x87   :  { %2145 = vmatprep.subr.mxu0 %v2922_v0  ;;  %2180 = vmatprep.subr.mxu1 %v2922_v0 }
  0x88   :  { %2146 = vmatpush3.msra.mxu0 %v3069_v31  ;;  %2181 = vmatpush3.msra.mxu1 %v3069_v31 }
  0x89   :  { %2147 = vmatprep.subr.mxu0 %v2922_v0  ;;  %2182 = vmatprep.subr.mxu1 %v2922_v0 }
  0x8a   :  { %2148 = vmatpush3.msra.mxu0 %v3072_v33  ;;  %2183 = vmatpush3.msra.mxu1 %v3072_v33 }
  0x8b   :  { %2184 = vmatprep.mubr.msk.f32.mxu1 %vm2923_vm0, %v2922_v0  ;;  %2187 = vmatprep.subr.mxu0 %v2922_v0 }
  0x8c   :  { %2222 = vmatprep.subr.mxu1 %v2922_v0  ;;  %2073 = vmatprep.mubr.f32.mxu0 %v117_v35  ;;  %v3369_v35 = vld [vmem:[#allocation11 + $0x68] sm:$0xff] }
  0x8d   :  { %2074 = vmatmul.mubr.f32.gmra.mxu0 %v118_v36  ;;  %v3373_v36 = vld [vmem:[#allocation11 + $0x60] sm:$0xff] }
  0x8e   :  { %2076 = vmatprep.mubr.f32.mxu0 %v119_v37  ;;  %v3377_v37 = vld [vmem:[#allocation11 + $0x58] sm:$0xff] }
  0x91   :  { %2077 = vmatmul.mubr.f32.gmra.mxu0 %v120_v38  ;;  %v3381_v38 = vld [vmem:[#allocation11 + $0x50] sm:$0xff] }
  0x92   :  { %2079 = vmatprep.mubr.f32.mxu0 %v121_v39  ;;  %v3385_v39 = vld [vmem:[#allocation11 + $0x48] sm:$0xff] }
  0x95   :  { %2080 = vmatmul.mubr.f32.gmra.mxu0 %v122_v40  ;;  %v3389_v40 = vld [vmem:[#allocation11 + $0x40] sm:$0xff] }
  0x96   :  { %2149 = vmatprep.mubr.msk.f32.mxu0 %vm2923_vm0, %v2922_v0 }
 0x12a   :  { %v2072_v41 = vpop.f32.mrf.mxu0  ;;  %v333_v42 = vpop.f32.mrf.mxu1 }
 0x12b   :  { %v234_v55 = vadd.f32 %v2072_v41, %v3151_v43  ;;  %v3393_v41 = vld [vmem:[#allocation11 + $0x38] sm:$0xff] }
 0x12c   :  { %v228_v44 = vpop.f32.mrf.mxu0  ;;  %v2116_v45 = vpop.f32.mrf.mxu1 }
 0x12d   :  { %v229_v46 = vadd.f32 %v3151_v43, %v228_v44  ;;  %v3401_v44 = vld [vmem:[#allocation11 + $0x28] sm:$0xff]  ;;  %v3405_v45 = vld [vmem:[#allocation11 + $0x20] sm:$0xff] }
 0x12f   :  { %v337_v47 = vadd.f32 %v333_v42, %v229_v46  ;;  %v3397_v42 = vld [vmem:[#allocation11 + $0x30] sm:$0xff]  ;;  %v3409_v46 = vld [vmem:[#allocation11 + $0x18] sm:$0xff] }
 0x131   :  { %2732 = vtanh.f32 %v337_v47  ;;  %v3413_v47 = vld [vmem:[#allocation11 + $0x10] sm:$0xff] }
 0x13e   :  { %v3154_v48 = vpop.eup %2732 }
 0x13f   :  { %2150 = vmatmul.mubr.f32.vlgmr.msra.gmra.mxu0 %v3154_v48 }
 0x140   :  { %2188 = vmatpush3.msra.mxu0 %v3014_v3  ;;  %2219 = vmatprep.mubr.msk.f32.mxu0 %vm2923_vm0, %v2922_v0 }
 0x141   :  { %2189 = vmatprep.subr.mxu0 %v2922_v0 }
 0x142   :  { %2190 = vmatpush3.msra.mxu0 %v3017_v4 }
 0x143   :  { %2191 = vmatprep.subr.mxu0 %v2922_v0 }
 0x144   :  { %2192 = vmatpush3.msra.mxu0 %v3020_v6 }
 0x145   :  { %2193 = vmatprep.subr.mxu0 %v2922_v0 }
 0x146   :  { %2194 = vmatpush3.msra.mxu0 %v3024_v8 }
 0x147   :  { %2195 = vmatprep.subr.mxu0 %v2922_v0 }
 0x148   :  { %2196 = vmatpush3.msra.mxu0 %v3028_v10 }
 0x149   :  { %2197 = vmatprep.subr.mxu0 %v2922_v0 }
 0x14a   :  { %2198 = vmatpush3.msra.mxu0 %v3032_v12 }
 0x14b   :  { %2199 = vmatprep.subr.mxu0 %v2922_v0 }
 0x14c   :  { %2200 = vmatpush3.msra.mxu0 %v3036_v14 }
 0x14d   :  { %2201 = vmatprep.subr.mxu0 %v2922_v0  ;;  %v3191_v49 = vpop.f32.mrf.mxu0 }
 0x14e   :  { %2202 = vmatpush3.msra.mxu0 %v3040_v16  ;;  %v244_v2 = vadd.f32 %v3191_v49, %v3151_v43  ;;  %v3421_v49 = vld [vmem:[#allocation11] sm:$0xff] }
 0x14f   :  { %2203 = vmatprep.subr.mxu0 %v2922_v0  ;;  %v238_v50 = vpop.f32.mrf.mxu0 }
 0x150   :  { %2204 = vmatpush3.msra.mxu0 %v3044_v18  ;;  %v239_v60 = vadd.f32 %v3151_v43, %v238_v50 }
 0x151   :  { %2205 = vmatprep.subr.mxu0 %v2922_v0  ;;  %v3193_v51 = vpop.f32.mrf.mxu0 }
 0x152   :  { %2206 = vmatpush3.msra.mxu0 %v3048_v20 }
 0x153   :  { %2207 = vmatprep.subr.mxu0 %v2922_v0  ;;  %v3195_v52 = vpop.f32.mrf.mxu0 }
 0x154   :  { %2208 = vmatpush3.msra.mxu0 %v3052_v22  ;;  %v249_v13 = vadd.f32 %v3151_v43, %v3195_v52 }
 0x155   :  { %2209 = vmatprep.subr.mxu0 %v2922_v0  ;;  %v3197_v53 = vpop.f32.mrf.mxu0 }
 0x156   :  { %2210 = vmatpush3.msra.mxu0 %v3056_v24 }
 0x157   :  { %2211 = vmatprep.subr.mxu0 %v2922_v0  ;;  %v3199_v54 = vpop.f32.mrf.mxu0 }
 0x158   :  { %2212 = vmatpush3.msra.mxu0 %v3060_v26  ;;  %v259_v50 = vadd.f32 %v3151_v43, %v3199_v54  ;;  %v264_v54 = vadd.f32 %v3197_v53, %v3151_v43 }
 0x159   :  { %2213 = vmatprep.subr.mxu0 %v2922_v0 }
 0x15a   :  { %2214 = vmatpush3.msra.mxu0 %v3064_v28 }
 0x15b   :  { %2215 = vmatprep.subr.mxu0 %v2922_v0 }
 0x15c   :  { %2216 = vmatpush3.msra.mxu0 %v3069_v31 }
 0x15d   :  { %2217 = vmatprep.subr.mxu0 %v2922_v0 }
 0x15e   :  { %2218 = vmatpush3.msra.mxu0 %v3072_v33 }
 0x15f   :  { %2257 = vmatprep.subr.mxu0 %v2922_v0 }
 0x1ff   :  { %v406_v56 = vpop.f32.mrf.mxu0 }
 0x200   :  { %v410_v57 = vadd.f32 %v406_v56, %v234_v55 }
 0x201   :  { %v2151_v58 = vpop.f32.mrf.mxu0 }
 0x202   :  { %2734 = vtanh.f32 %v410_v57 }
 0x20f   :  { %v3202_v59 = vpop.eup %2734 }
 0x210   :  { %2185 = vmatmul.mubr.f32.vlgmr.msra.gmra.mxu1 %v3202_v59 }
 0x211   :  { %2223 = vmatpush3.msra.mxu1 %v3014_v3  ;;  %2254 = vmatprep.mubr.msk.f32.mxu1 %vm2923_vm0, %v2922_v0 }
 0x212   :  { %2224 = vmatprep.subr.mxu1 %v2922_v0 }
 0x213   :  { %2225 = vmatpush3.msra.mxu1 %v3017_v4 }
 0x214   :  { %2226 = vmatprep.subr.mxu1 %v2922_v0 }
 0x215   :  { %2227 = vmatpush3.msra.mxu1 %v3020_v6 }
 0x216   :  { %2228 = vmatprep.subr.mxu1 %v2922_v0 }
 0x217   :  { %2229 = vmatpush3.msra.mxu1 %v3024_v8 }
 0x218   :  { %2230 = vmatprep.subr.mxu1 %v2922_v0 }
 0x219   :  { %2231 = vmatpush3.msra.mxu1 %v3028_v10 }
 0x21a   :  { %2232 = vmatprep.subr.mxu1 %v2922_v0 }
 0x21b   :  { %2233 = vmatpush3.msra.mxu1 %v3032_v12 }
 0x21c   :  { %2234 = vmatprep.subr.mxu1 %v2922_v0 }
 0x21d   :  { %2235 = vmatpush3.msra.mxu1 %v3036_v14 }
 0x21e   :  { %2236 = vmatprep.subr.mxu1 %v2922_v0 }
 0x21f   :  { %2237 = vmatpush3.msra.mxu1 %v3040_v16 }
 0x220   :  { %2238 = vmatprep.subr.mxu1 %v2922_v0 }
 0x221   :  { %2239 = vmatpush3.msra.mxu1 %v3044_v18 }
 0x222   :  { %2240 = vmatprep.subr.mxu1 %v2922_v0 }
 0x223   :  { %2241 = vmatpush3.msra.mxu1 %v3048_v20 }
 0x224   :  { %2242 = vmatprep.subr.mxu1 %v2922_v0 }
 0x225   :  { %2243 = vmatpush3.msra.mxu1 %v3052_v22 }
 0x226   :  { %2244 = vmatprep.subr.mxu1 %v2922_v0 }
 0x227   :  { %2245 = vmatpush3.msra.mxu1 %v3056_v24 }
 0x228   :  { %2246 = vmatprep.subr.mxu1 %v2922_v0 }
 0x229   :  { %2247 = vmatpush3.msra.mxu1 %v3060_v26 }
 0x22a   :  { %2248 = vmatprep.subr.mxu1 %v2922_v0 }
 0x22b   :  { %2249 = vmatpush3.msra.mxu1 %v3064_v28 }
 0x22c   :  { %2250 = vmatprep.subr.mxu1 %v2922_v0 }
 0x22d   :  { %2251 = vmatpush3.msra.mxu1 %v3069_v31 }
 0x22e   :  { %2252 = vmatprep.subr.mxu1 %v2922_v0 }
 0x22f   :  { %2253 = vmatpush3.msra.mxu1 %v3072_v33 }
 0x230   :  { %2292 = vmatprep.subr.mxu1 %v2922_v0 }
 0x2d0   :  { %v480_v61 = vpop.f32.mrf.mxu1 }
 0x2d1   :  { %v484_v62 = vadd.f32 %v480_v61, %v239_v60 }
 0x2d2   :  { %v2186_v63 = vpop.f32.mrf.mxu1 }
 0x2d3   :  { %2736 = vtanh.f32 %v484_v62  ;;  %v3504_v63 = vld [vmem:[%s3727_s6] ss:$0 sm:$0xff] }
 0x2e0   :  { %v3240_v1 = vpop.eup %2736 }
 0x2e1   :  { %2220 = vmatmul.mubr.f32.vlgmr.msra.gmra.mxu0 %v3240_v1 }
 0x2e2   :  { %2258 = vmatpush3.msra.mxu0 %v3014_v3  ;;  %2289 = vmatprep.mubr.msk.f32.mxu0 %vm2923_vm0, %v2922_v0 }
 0x2e3   :  { %2259 = vmatprep.subr.mxu0 %v2922_v0 }
 0x2e4   :  { %2260 = vmatpush3.msra.mxu0 %v3017_v4 }
 0x2e5   :  { %2261 = vmatprep.subr.mxu0 %v2922_v0 }
 0x2e6   :  { %2262 = vmatpush3.msra.mxu0 %v3020_v6 }
 0x2e7   :  { %2263 = vmatprep.subr.mxu0 %v2922_v0 }
 0x2e8   :  { %2264 = vmatpush3.msra.mxu0 %v3024_v8 }
 0x2e9   :  { %2265 = vmatprep.subr.mxu0 %v2922_v0 }
 0x2ea   :  { %2266 = vmatpush3.msra.mxu0 %v3028_v10 }
 0x2eb   :  { %2267 = vmatprep.subr.mxu0 %v2922_v0 }
 0x2ec   :  { %2268 = vmatpush3.msra.mxu0 %v3032_v12 }
 0x2ed   :  { %2269 = vmatprep.subr.mxu0 %v2922_v0 }
 0x2ee   :  { %2270 = vmatpush3.msra.mxu0 %v3036_v14 }
 0x2ef   :  { %2271 = vmatprep.subr.mxu0 %v2922_v0 }
 0x2f0   :  { %2272 = vmatpush3.msra.mxu0 %v3040_v16 }
 0x2f1   :  { %2273 = vmatprep.subr.mxu0 %v2922_v0 }
 0x2f2   :  { %2274 = vmatpush3.msra.mxu0 %v3044_v18 }
 0x2f3   :  { %2275 = vmatprep.subr.mxu0 %v2922_v0 }
 0x2f4   :  { %2276 = vmatpush3.msra.mxu0 %v3048_v20 }
 0x2f5   :  { %2277 = vmatprep.subr.mxu0 %v2922_v0 }
 0x2f6   :  { %2278 = vmatpush3.msra.mxu0 %v3052_v22 }
 0x2f7   :  { %2279 = vmatprep.subr.mxu0 %v2922_v0 }
 0x2f8   :  { %2280 = vmatpush3.msra.mxu0 %v3056_v24 }
 0x2f9   :  { %2281 = vmatprep.subr.mxu0 %v2922_v0 }
 0x2fa   :  { %2282 = vmatpush3.msra.mxu0 %v3060_v26 }
 0x2fb   :  { %2283 = vmatprep.subr.mxu0 %v2922_v0 }
 0x2fc   :  { %2284 = vmatpush3.msra.mxu0 %v3064_v28 }
 0x2fd   :  { %2285 = vmatprep.subr.mxu0 %v2922_v0 }
 0x2fe   :  { %2286 = vmatpush3.msra.mxu0 %v3069_v31 }
 0x2ff   :  { %2287 = vmatprep.subr.mxu0 %v2922_v0 }
 0x300   :  { %2288 = vmatpush3.msra.mxu0 %v3072_v33 }
 0x301   :  { %2327 = vmatprep.subr.mxu0 %v2922_v0 }
 0x3a1   :  { %v554_v5 = vpop.f32.mrf.mxu0 }
 0x3a2   :  { %v558_v7 = vadd.f32 %v554_v5, %v244_v2 }
 0x3a3   :  { %v2221_v9 = vpop.f32.mrf.mxu0 }
 0x3a4   :  { %2738 = vtanh.f32 %v558_v7 }
 0x3b1   :  { %v3279_v11 = vpop.eup %2738 }
 0x3b2   :  { %2255 = vmatmul.mubr.f32.vlgmr.msra.gmra.mxu1 %v3279_v11 }
 0x3b3   :  { %2293 = vmatpush3.msra.mxu1 %v3014_v3  ;;  %2324 = vmatprep.mubr.msk.f32.mxu1 %vm2923_vm0, %v2922_v0 }
 0x3b4   :  { %2294 = vmatprep.subr.mxu1 %v2922_v0 }
 0x3b5   :  { %2295 = vmatpush3.msra.mxu1 %v3017_v4 }
 0x3b6   :  { %2296 = vmatprep.subr.mxu1 %v2922_v0 }
 0x3b7   :  { %2297 = vmatpush3.msra.mxu1 %v3020_v6 }
 0x3b8   :  { %2298 = vmatprep.subr.mxu1 %v2922_v0 }
 0x3b9   :  { %2299 = vmatpush3.msra.mxu1 %v3024_v8 }
 0x3ba   :  { %2300 = vmatprep.subr.mxu1 %v2922_v0 }
 0x3bb   :  { %2301 = vmatpush3.msra.mxu1 %v3028_v10 }
 0x3bc   :  { %2302 = vmatprep.subr.mxu1 %v2922_v0 }
 0x3bd   :  { %2303 = vmatpush3.msra.mxu1 %v3032_v12 }
 0x3be   :  { %2304 = vmatprep.subr.mxu1 %v2922_v0 }
 0x3bf   :  { %2305 = vmatpush3.msra.mxu1 %v3036_v14 }
 0x3c0   :  { %2306 = vmatprep.subr.mxu1 %v2922_v0 }
 0x3c1   :  { %2307 = vmatpush3.msra.mxu1 %v3040_v16 }
 0x3c2   :  { %2308 = vmatprep.subr.mxu1 %v2922_v0 }
 0x3c3   :  { %2309 = vmatpush3.msra.mxu1 %v3044_v18 }
 0x3c4   :  { %2310 = vmatprep.subr.mxu1 %v2922_v0 }
 0x3c5   :  { %2311 = vmatpush3.msra.mxu1 %v3048_v20 }
 0x3c6   :  { %2312 = vmatprep.subr.mxu1 %v2922_v0 }
 0x3c7   :  { %2313 = vmatpush3.msra.mxu1 %v3052_v22 }
 0x3c8   :  { %2314 = vmatprep.subr.mxu1 %v2922_v0 }
 0x3c9   :  { %2315 = vmatpush3.msra.mxu1 %v3056_v24 }
 0x3ca   :  { %2316 = vmatprep.subr.mxu1 %v2922_v0 }
 0x3cb   :  { %2317 = vmatpush3.msra.mxu1 %v3060_v26 }
 0x3cc   :  { %2318 = vmatprep.subr.mxu1 %v2922_v0 }
 0x3cd   :  { %2319 = vmatpush3.msra.mxu1 %v3064_v28 }
 0x3ce   :  { %2320 = vmatprep.subr.mxu1 %v2922_v0 }
 0x3cf   :  { %2321 = vmatpush3.msra.mxu1 %v3069_v31 }
 0x3d0   :  { %2322 = vmatprep.subr.mxu1 %v2922_v0 }
 0x3d1   :  { %2323 = vmatpush3.msra.mxu1 %v3072_v33 }
 0x472   :  { %v628_v15 = vpop.f32.mrf.mxu1 }
 0x473   :  { %v632_v17 = vadd.f32 %v628_v15, %v249_v13 }
 0x474   :  { %v2256_v19 = vpop.f32.mrf.mxu1 }
 0x475   :  { %2740 = vtanh.f32 %v632_v17 }
 0x482   :  { %v3317_v21 = vpop.eup %2740 }
 0x483   :  { %2290 = vmatmul.mubr.f32.vlgmr.msra.gmra.mxu0 %v3317_v21 }
 0x484   :  { %2328 = vmatpush3.msra.mxu0 %v3014_v3  ;;  %2359 = vmatprep.mubr.msk.f32.mxu0 %vm2923_vm0, %v2922_v0  ;;  %v881_v3 = vld [vmem:[#allocation8 + $0x78] sm:$0xff] }
 0x485   :  { %2329 = vmatprep.subr.mxu0 %v2922_v0  ;;  %2362 = vmatprep.subr.mxu1 %v881_v3 }
 0x486   :  { %2330 = vmatpush3.msra.mxu0 %v3017_v4  ;;  %v254_v4 = vadd.f32 %v3193_v51, %v3151_v43 }
 0x487   :  { %2331 = vmatprep.subr.mxu0 %v2922_v0 }
 0x488   :  { %2332 = vmatpush3.msra.mxu0 %v3020_v6 }
 0x489   :  { %2333 = vmatprep.subr.mxu0 %v2922_v0 }
 0x48a   :  { %2334 = vmatpush3.msra.mxu0 %v3024_v8 }
 0x48b   :  { %2335 = vmatprep.subr.mxu0 %v2922_v0 }
 0x48c   :  { %2336 = vmatpush3.msra.mxu0 %v3028_v10 }
 0x48d   :  { %2337 = vmatprep.subr.mxu0 %v2922_v0 }
 0x48e   :  { %2338 = vmatpush3.msra.mxu0 %v3032_v12 }
 0x48f   :  { %2339 = vmatprep.subr.mxu0 %v2922_v0 }
 0x490   :  { %2340 = vmatpush3.msra.mxu0 %v3036_v14  ;;  %v880_v14 = vld [vmem:[#allocation8 + $0x70] sm:$0xff] }
 0x491   :  { %2341 = vmatprep.subr.mxu0 %v2922_v0 }
 0x492   :  { %2342 = vmatpush3.msra.mxu0 %v3040_v16  ;;  %v879_v16 = vld [vmem:[#allocation8 + $0x68] sm:$0xff] }
 0x493   :  { %2343 = vmatprep.subr.mxu0 %v2922_v0 }
 0x494   :  { %2344 = vmatpush3.msra.mxu0 %v3044_v18  ;;  %v878_v18 = vld [vmem:[#allocation8 + $0x60] sm:$0xff] }
 0x495   :  { %2345 = vmatprep.subr.mxu0 %v2922_v0 }
 0x496   :  { %2346 = vmatpush3.msra.mxu0 %v3048_v20  ;;  %v877_v20 = vld [vmem:[#allocation8 + $0x58] sm:$0xff] }
 0x497   :  { %2347 = vmatprep.subr.mxu0 %v2922_v0 }
 0x498   :  { %2348 = vmatpush3.msra.mxu0 %v3052_v22  ;;  %v876_v22 = vld [vmem:[#allocation8 + $0x50] sm:$0xff] }
 0x499   :  { %2349 = vmatprep.subr.mxu0 %v2922_v0 }
 0x49a   :  { %2350 = vmatpush3.msra.mxu0 %v3056_v24  ;;  %v874_v24 = vld [vmem:[#allocation8 + $0x40] sm:$0xff] }
 0x49b   :  { %2351 = vmatprep.subr.mxu0 %v2922_v0 }
 0x49c   :  { %2352 = vmatpush3.msra.mxu0 %v3060_v26  ;;  %v872_v26 = vld [vmem:[#allocation8 + $0x30] sm:$0xff] }
 0x49d   :  { %2353 = vmatprep.subr.mxu0 %v2922_v0 }
 0x49e   :  { %2354 = vmatpush3.msra.mxu0 %v3064_v28  ;;  %v870_v28 = vld [vmem:[#allocation8 + $0x20] sm:$0xff] }
 0x49f   :  { %2355 = vmatprep.subr.mxu0 %v2922_v0 }
 0x4a0   :  { %2356 = vmatpush3.msra.mxu0 %v3069_v31  ;;  %v867_v31 = vld [vmem:[#allocation8 + $0x8] sm:$0xff] }
 0x4a1   :  { %2357 = vmatprep.subr.mxu0 %v2922_v0 }
 0x4a2   :  { %2358 = vmatpush3.msra.mxu0 %v3072_v33  ;;  %v3362_v33 = vld [vmem:[#allocation11 + $0x78] sm:$0xff] }
 0x4a3   :  { %2406 = vmatprep.subr.mxu0 %v2922_v0 }
 0x543   :  { %v702_v6 = vpop.f32.mrf.mxu0 }
 0x544   :  { %v706_v8 = vadd.f32 %v702_v6, %v254_v4 }
 0x545   :  { %v2291_v10 = vpop.f32.mrf.mxu0 }
 0x546   :  { %2742 = vtanh.f32 %v706_v8 }
 0x553   :  { %v2743_v12 = vpop.eup %2742 }
 0x554   :  { %2325 = vmatmul.mubr.f32.vlgmr.msra.gmra.mxu1 %v2743_v12 }
 0x555   :  { %2363 = vmatpush3.msra.mxu1 %v881_v3  ;;  %2394 = vmatprep.mubr.f32.mxu1 %v3154_v48  ;;  %v3417_v48 = vld [vmem:[#allocation11 + $0x8] sm:$0xff] }
 0x556   :  { %2364 = vmatprep.subr.mxu1 %v880_v14 }
 0x557   :  { %2365 = vmatpush3.msra.mxu1 %v880_v14 }
 0x558   :  { %2366 = vmatprep.subr.mxu1 %v879_v16 }
 0x559   :  { %2367 = vmatpush3.msra.mxu1 %v879_v16 }
 0x55a   :  { %2368 = vmatprep.subr.mxu1 %v878_v18 }
 0x55b   :  { %2369 = vmatpush3.msra.mxu1 %v878_v18 }
 0x55c   :  { %2370 = vmatprep.subr.mxu1 %v877_v20 }
 0x55d   :  { %2371 = vmatpush3.msra.mxu1 %v877_v20 }
 0x55e   :  { %2372 = vmatprep.subr.mxu1 %v876_v22 }
 0x55f   :  { %2373 = vmatpush3.msra.mxu1 %v876_v22 }
 0x560   :  { %2374 = vmatprep.subr.mxu1 %v875_v23 }
 0x561   :  { %2375 = vmatpush3.msra.mxu1 %v875_v23 }
 0x562   :  { %2376 = vmatprep.subr.mxu1 %v874_v24 }
 0x563   :  { %2377 = vmatpush3.msra.mxu1 %v874_v24 }
 0x564   :  { %2378 = vmatprep.subr.mxu1 %v873_v25 }
 0x565   :  { %2379 = vmatpush3.msra.mxu1 %v873_v25 }
 0x566   :  { %2380 = vmatprep.subr.mxu1 %v872_v26 }
 0x567   :  { %2381 = vmatpush3.msra.mxu1 %v872_v26 }
 0x568   :  { %2382 = vmatprep.subr.mxu1 %v871_v27 }
 0x569   :  { %2383 = vmatpush3.msra.mxu1 %v871_v27 }
 0x56a   :  { %2384 = vmatprep.subr.mxu1 %v870_v28 }
 0x56b   :  { %2385 = vmatpush3.msra.mxu1 %v870_v28 }
 0x56c   :  { %2386 = vmatprep.subr.mxu1 %v869_v29 }
 0x56d   :  { %2387 = vmatpush3.msra.mxu1 %v869_v29 }
 0x56e   :  { %2388 = vmatprep.subr.mxu1 %v868_v30 }
 0x56f   :  { %2389 = vmatpush3.msra.mxu1 %v868_v30 }
 0x570   :  { %2390 = vmatprep.subr.mxu1 %v867_v31 }
 0x571   :  { %2391 = vmatpush3.msra.mxu1 %v867_v31 }
 0x572   :  { %2392 = vmatprep.subr.mxu1 %v866_v32 }
 0x573   :  { %2393 = vmatpush3.msra.mxu1 %v866_v32 }
 0x574   :  { %2395 = vmatmul.mubr.f32.vlgmr.msra.gmra.mxu1 %v3202_v59  ;;  %2441 = vmatprep.subr.mxu1 %v2922_v0 }
 0x575   :  { %2397 = vmatprep.mubr.f32.mxu1 %v3240_v1  ;;  %2442 = vmatpush3.msra.mxu1 %v3362_v33 }
 0x576   :  { %2443 = vmatprep.subr.mxu1 %v2922_v0 }
 0x577   :  { %2444 = vmatpush3.msra.mxu1 %v3365_v34 }
 0x578   :  { %2398 = vmatmul.mubr.f32.gmra.mxu1 %v3279_v11  ;;  %2445 = vmatprep.subr.mxu1 %v2922_v0 }
 0x579   :  { %2400 = vmatprep.mubr.f32.mxu1 %v3317_v21  ;;  %2446 = vmatpush3.msra.mxu1 %v3369_v35 }
 0x57a   :  { %2447 = vmatprep.subr.mxu1 %v2922_v0 }
 0x57b   :  { %2448 = vmatpush3.msra.mxu1 %v3373_v36 }
 0x57c   :  { %2401 = vmatmul.mubr.f32.gmra.mxu1 %v2743_v12  ;;  %2449 = vmatprep.subr.mxu1 %v2922_v0 }
 0x57d   :  { %2450 = vmatpush3.msra.mxu1 %v3377_v37 }
 0x57e   :  { %2451 = vmatprep.subr.mxu1 %v2922_v0 }
 0x57f   :  { %2452 = vmatpush3.msra.mxu1 %v3381_v38 }
 0x580   :  { %2453 = vmatprep.subr.mxu1 %v2922_v0 }
 0x581   :  { %2454 = vmatpush3.msra.mxu1 %v3385_v39 }
 0x582   :  { %2455 = vmatprep.subr.mxu1 %v2922_v0 }
 0x583   :  { %2456 = vmatpush3.msra.mxu1 %v3389_v40 }
 0x584   :  { %2457 = vmatprep.subr.mxu1 %v2922_v0 }
 0x585   :  { %2458 = vmatpush3.msra.mxu1 %v3393_v41 }
 0x586   :  { %2459 = vmatprep.subr.mxu1 %v2922_v0 }
 0x587   :  { %2460 = vmatpush3.msra.mxu1 %v3397_v42 }
 0x588   :  { %2461 = vmatprep.subr.mxu1 %v2922_v0 }
 0x589   :  { %2462 = vmatpush3.msra.mxu1 %v3401_v44 }
 0x58a   :  { %2463 = vmatprep.subr.mxu1 %v2922_v0 }
 0x58b   :  { %2464 = vmatpush3.msra.mxu1 %v3405_v45 }
 0x58c   :  { %2465 = vmatprep.subr.mxu1 %v2922_v0 }
 0x58d   :  { %2466 = vmatpush3.msra.mxu1 %v3409_v46 }
 0x58e   :  { %2467 = vmatprep.subr.mxu1 %v2922_v0 }
 0x58f   :  { %2468 = vmatpush3.msra.mxu1 %v3413_v47 }
 0x590   :  { %2469 = vmatprep.subr.mxu1 %v2922_v0 }
 0x591   :  { %2470 = vmatpush3.msra.mxu1 %v3417_v48 }
 0x592   :  { %2471 = vmatprep.subr.mxu1 %v2922_v0 }
 0x593   :  { %2472 = vmatpush3.msra.mxu1 %v3421_v49 }
 0x594   :  { %2511 = vmatprep.subr.mxu1 %v2922_v0 }
 0x614   :  { %v776_v51 = vpop.f32.mrf.mxu1 }
 0x615   :  { %v780_v52 = vadd.f32 %v776_v51, %v259_v50  ;;  %v1592_v50 = vld [vmem:[#allocation12 + $0x30] sm:$0xff]  ;;  %v1591_v51 = vld [vmem:[#allocation12 + $0x28] sm:$0xff] }
 0x616   :  { %v2326_v55 = vpop.f32.mrf.mxu1 }
 0x617   :  { %2744 = vtanh.f32 %v780_v52  ;;  %v1590_v52 = vld [vmem:[#allocation12 + $0x20] sm:$0xff]  ;;  %v1589_v55 = vld [vmem:[#allocation12 + $0x18] sm:$0xff] }
 0x624   :  { %v2745_v56 = vpop.eup %2744 }
 0x625   :  { %2360 = vmatmul.mubr.f32.vlgmr.msra.gmra.mxu0 %v2745_v56  ;;  %2403 = vmatprep.mubr.f32.mxu1 %v2745_v56  ;;  %v1588_v56 = vld [vmem:[#allocation12 + $0x10] sm:$0xff] }
 0x626   :  { %2407 = vmatpush3.msra.mxu0 %v3362_v33  ;;  %2438 = vmatprep.mubr.msk.f32.mxu0 %vm2923_vm0, %v2922_v0 }
 0x627   :  { %2408 = vmatprep.subr.mxu0 %v2922_v0 }
 0x628   :  { %2409 = vmatpush3.msra.mxu0 %v3365_v34 }
 0x629   :  { %2410 = vmatprep.subr.mxu0 %v2922_v0 }
 0x62a   :  { %2411 = vmatpush3.msra.mxu0 %v3369_v35 }
 0x62b   :  { %2412 = vmatprep.subr.mxu0 %v2922_v0 }
 0x62c   :  { %2413 = vmatpush3.msra.mxu0 %v3373_v36 }
 0x62d   :  { %2414 = vmatprep.subr.mxu0 %v2922_v0 }
 0x62e   :  { %2415 = vmatpush3.msra.mxu0 %v3377_v37 }
 0x62f   :  { %2416 = vmatprep.subr.mxu0 %v2922_v0 }
 0x630   :  { %2417 = vmatpush3.msra.mxu0 %v3381_v38 }
 0x631   :  { %2418 = vmatprep.subr.mxu0 %v2922_v0 }
 0x632   :  { %2419 = vmatpush3.msra.mxu0 %v3385_v39 }
 0x633   :  { %2420 = vmatprep.subr.mxu0 %v2922_v0 }
 0x634   :  { %2421 = vmatpush3.msra.mxu0 %v3389_v40  ;;  %v2396_v61 = vpop.f32.mrf.mxu1 }
 0x635   :  { %2422 = vmatprep.subr.mxu0 %v2922_v0  ;;  %v977_v19 = vadd.f32 %v2396_v61, %v3504_v63 }
 0x636   :  { %2423 = vmatpush3.msra.mxu0 %v3393_v41  ;;  %v971_v62 = vpop.f32.mrf.mxu1 }
 0x637   :  { %2424 = vmatprep.subr.mxu0 %v2922_v0  ;;  %v972_v1 = vadd.f32 %v3504_v63, %v971_v62 }
 0x638   :  { %2425 = vmatpush3.msra.mxu0 %v3397_v42  ;;  %v3541_v7 = vpop.f32.mrf.mxu1 }
 0x639   :  { %2426 = vmatprep.subr.mxu0 %v2922_v0  ;;  %v987_v18 = vadd.f32 %v3541_v7, %v3504_v63 }
 0x63a   :  { %2427 = vmatpush3.msra.mxu0 %v3401_v44  ;;  %v981_v9 = vpop.f32.mrf.mxu1 }
 0x63b   :  { %2428 = vmatprep.subr.mxu0 %v2922_v0  ;;  %v982_v8 = vadd.f32 %v3504_v63, %v981_v9 }
 0x63c   :  { %2429 = vmatpush3.msra.mxu0 %v3405_v45  ;;  %v3543_v11 = vpop.f32.mrf.mxu1 }
 0x63d   :  { %2430 = vmatprep.subr.mxu0 %v2922_v0  ;;  %v997_v30 = vadd.f32 %v3543_v11, %v3504_v63 }
 0x63e   :  { %2431 = vmatpush3.msra.mxu0 %v3409_v46  ;;  %v3545_v13 = vpop.f32.mrf.mxu1 }
 0x63f   :  { %2432 = vmatprep.subr.mxu0 %v2922_v0  ;;  %v992_v25 = vadd.f32 %v3504_v63, %v3545_v13 }
 0x640   :  { %2433 = vmatpush3.msra.mxu0 %v3413_v47 }
 0x641   :  { %2434 = vmatprep.subr.mxu0 %v2922_v0 }
 0x642   :  { %2435 = vmatpush3.msra.mxu0 %v3417_v48 }
 0x643   :  { %2436 = vmatprep.subr.mxu0 %v2922_v0 }
 0x644   :  { %2437 = vmatpush3.msra.mxu0 %v3421_v49 }
 0x645   :  { %2439 = vmatmul.mubr.f32.vlgmr.msra.gmra.mxu0 %v2922_v0  ;;  %2476 = vmatprep.subr.mxu0 %v2922_v0 }
 0x646   :  { %2477 = vmatpush3.msra.mxu0 %v3362_v33  ;;  %2508 = vmatprep.mubr.msk.f32.mxu0 %vm2923_vm0, %v2922_v0 }
 0x647   :  { %2478 = vmatprep.subr.mxu0 %v2922_v0 }
 0x648   :  { %2479 = vmatpush3.msra.mxu0 %v3365_v34 }
 0x649   :  { %2480 = vmatprep.subr.mxu0 %v2922_v0 }
 0x64a   :  { %2481 = vmatpush3.msra.mxu0 %v3369_v35 }
 0x64b   :  { %2482 = vmatprep.subr.mxu0 %v2922_v0 }
 0x64c   :  { %2483 = vmatpush3.msra.mxu0 %v3373_v36 }
 0x64d   :  { %2484 = vmatprep.subr.mxu0 %v2922_v0 }
 0x64e   :  { %2485 = vmatpush3.msra.mxu0 %v3377_v37 }
 0x64f   :  { %2486 = vmatprep.subr.mxu0 %v2922_v0 }
 0x650   :  { %2487 = vmatpush3.msra.mxu0 %v3381_v38 }
 0x651   :  { %2488 = vmatprep.subr.mxu0 %v2922_v0 }
 0x652   :  { %2489 = vmatpush3.msra.mxu0 %v3385_v39 }
 0x653   :  { %2490 = vmatprep.subr.mxu0 %v2922_v0 }
 0x654   :  { %2491 = vmatpush3.msra.mxu0 %v3389_v40 }
 0x655   :  { %2492 = vmatprep.subr.mxu0 %v2922_v0 }
 0x656   :  { %2493 = vmatpush3.msra.mxu0 %v3393_v41 }
 0x657   :  { %2494 = vmatprep.subr.mxu0 %v2922_v0 }
 0x658   :  { %2495 = vmatpush3.msra.mxu0 %v3397_v42 }
 0x659   :  { %2496 = vmatprep.subr.mxu0 %v2922_v0 }
 0x65a   :  { %2497 = vmatpush3.msra.mxu0 %v3401_v44 }
 0x65b   :  { %2498 = vmatprep.subr.mxu0 %v2922_v0 }
 0x65c   :  { %2499 = vmatpush3.msra.mxu0 %v3405_v45 }
 0x65d   :  { %2500 = vmatprep.subr.mxu0 %v2922_v0 }
 0x65e   :  { %2501 = vmatpush3.msra.mxu0 %v3409_v46 }
 0x65f   :  { %2502 = vmatprep.subr.mxu0 %v2922_v0 }
 0x660   :  { %2503 = vmatpush3.msra.mxu0 %v3413_v47 }
 0x661   :  { %2504 = vmatprep.subr.mxu0 %v2922_v0 }
 0x662   :  { %2505 = vmatpush3.msra.mxu0 %v3417_v48 }
 0x663   :  { %2506 = vmatprep.subr.mxu0 %v2922_v0 }
 0x664   :  { %2507 = vmatpush3.msra.mxu0 %v3421_v49 }
 0x665   :  { %2546 = vmatprep.subr.mxu0 %v2922_v0 }
 0x6e5   :  { %v850_v57 = vpop.f32.mrf.mxu0 }
 0x6e6   :  { %v854_v58 = vadd.f32 %v850_v57, %v264_v54  ;;  %v1587_v54 = vld [vmem:[#allocation12 + $0x8] sm:$0xff]  ;;  %v1586_v57 = vld [vmem:[#allocation12] sm:$0xff] }
 0x6e7   :  { %v2361_v59 = vpop.f32.mrf.mxu0 }
 0x6e8   :  { %2746 = vtanh.f32 %v854_v58 }
 0x6f5   :  { %v2747_v60 = vpop.eup %2746 }
 0x6f6   :  { %2404 = vmatmul.mubr.f32.gmra.mxu1 %v2747_v60 }
 0x6f7   :  { %2473 = vmatprep.mubr.msk.f32.mxu1 %vm2923_vm0, %v2922_v0 }
 0x705   :  { %v1076_v2 = vpop.f32.mrf.mxu0 }
 0x706   :  { %v1080_v43 = vadd.f32 %v1076_v2, %v972_v1  ;;  %v1700_v1 = vld [vmem:[%s3729_s8] ss:$0 sm:$0xff] }
 0x707   :  { %v2440_v53 = vpop.f32.mrf.mxu0 }
 0x708   :  { %2748 = vtanh.f32 %v1080_v43 }
 0x715   :  { %v2749_v5 = vpop.eup %2748 }
 0x716   :  { %2474 = vmatmul.mubr.f32.vlgmr.msra.gmra.mxu1 %v2749_v5 }
 0x717   :  { %2512 = vmatpush3.msra.mxu1 %v3362_v33  ;;  %2543 = vmatprep.mubr.msk.f32.mxu1 %vm2923_vm0, %v2922_v0 }
 0x718   :  { %2513 = vmatprep.subr.mxu1 %v2922_v0 }
 0x719   :  { %2514 = vmatpush3.msra.mxu1 %v3365_v34 }
 0x71a   :  { %2515 = vmatprep.subr.mxu1 %v2922_v0 }
 0x71b   :  { %2516 = vmatpush3.msra.mxu1 %v3369_v35 }
 0x71c   :  { %2517 = vmatprep.subr.mxu1 %v2922_v0 }
 0x71d   :  { %2518 = vmatpush3.msra.mxu1 %v3373_v36 }
 0x71e   :  { %2519 = vmatprep.subr.mxu1 %v2922_v0 }
 0x71f   :  { %2520 = vmatpush3.msra.mxu1 %v3377_v37 }
 0x720   :  { %2521 = vmatprep.subr.mxu1 %v2922_v0 }
 0x721   :  { %2522 = vmatpush3.msra.mxu1 %v3381_v38 }
 0x722   :  { %2523 = vmatprep.subr.mxu1 %v2922_v0 }
 0x723   :  { %2524 = vmatpush3.msra.mxu1 %v3385_v39 }
 0x724   :  { %2525 = vmatprep.subr.mxu1 %v2922_v0 }
 0x725   :  { %2526 = vmatpush3.msra.mxu1 %v3389_v40 }
 0x726   :  { %2527 = vmatprep.subr.mxu1 %v2922_v0 }
 0x727   :  { %2528 = vmatpush3.msra.mxu1 %v3393_v41 }
 0x728   :  { %2529 = vmatprep.subr.mxu1 %v2922_v0 }
 0x729   :  { %2530 = vmatpush3.msra.mxu1 %v3397_v42 }
 0x72a   :  { %2531 = vmatprep.subr.mxu1 %v2922_v0 }
 0x72b   :  { %2532 = vmatpush3.msra.mxu1 %v3401_v44 }
 0x72c   :  { %2533 = vmatprep.subr.mxu1 %v2922_v0 }
 0x72d   :  { %2534 = vmatpush3.msra.mxu1 %v3405_v45 }
 0x72e   :  { %2535 = vmatprep.subr.mxu1 %v2922_v0 }
 0x72f   :  { %2536 = vmatpush3.msra.mxu1 %v3409_v46 }
 0x730   :  { %2537 = vmatprep.subr.mxu1 %v2922_v0 }
 0x731   :  { %2538 = vmatpush3.msra.mxu1 %v3413_v47 }
 0x732   :  { %2539 = vmatprep.subr.mxu1 %v2922_v0 }
 0x733   :  { %2540 = vmatpush3.msra.mxu1 %v3417_v48 }
 0x734   :  { %2541 = vmatprep.subr.mxu1 %v2922_v0 }
 0x735   :  { %2542 = vmatpush3.msra.mxu1 %v3421_v49 }
 0x736   :  { %2581 = vmatprep.subr.mxu1 %v2922_v0 }
 0x7b6   :  { %v3547_v15 = vpop.f32.mrf.mxu1 }
 0x7b7   :  { %v1007_v58 = vadd.f32 %v3547_v15, %v3504_v63 }
 0x7b8   :  { %v3549_v17 = vpop.f32.mrf.mxu1 }
 0x7d6   :  { %v1148_v21 = vpop.f32.mrf.mxu1 }
 0x7d7   :  { %v1152_v3 = vadd.f32 %v1148_v21, %v977_v19 }
 0x7d8   :  { %v2475_v4 = vpop.f32.mrf.mxu1 }
 0x7d9   :  { %2750 = vtanh.f32 %v1152_v3 }
 0x7e6   :  { %v2751_v6 = vpop.eup %2750 }
 0x7e7   :  { %2509 = vmatmul.mubr.f32.vlgmr.msra.gmra.mxu0 %v2751_v6 }
 0x7e8   :  { %2547 = vmatpush3.msra.mxu0 %v3362_v33  ;;  %2578 = vmatprep.mubr.msk.f32.mxu0 %vm2923_vm0, %v2922_v0 }
 0x7e9   :  { %2548 = vmatprep.subr.mxu0 %v2922_v0 }
 0x7ea   :  { %2549 = vmatpush3.msra.mxu0 %v3365_v34 }
 0x7eb   :  { %2550 = vmatprep.subr.mxu0 %v2922_v0 }
 0x7ec   :  { %2551 = vmatpush3.msra.mxu0 %v3369_v35 }
 0x7ed   :  { %2552 = vmatprep.subr.mxu0 %v2922_v0 }
 0x7ee   :  { %2553 = vmatpush3.msra.mxu0 %v3373_v36 }
 0x7ef   :  { %2554 = vmatprep.subr.mxu0 %v2922_v0 }
 0x7f0   :  { %2555 = vmatpush3.msra.mxu0 %v3377_v37 }
 0x7f1   :  { %2556 = vmatprep.subr.mxu0 %v2922_v0 }
 0x7f2   :  { %2557 = vmatpush3.msra.mxu0 %v3381_v38 }
 0x7f3   :  { %2558 = vmatprep.subr.mxu0 %v2922_v0 }
 0x7f4   :  { %2559 = vmatpush3.msra.mxu0 %v3385_v39 }
 0x7f5   :  { %2560 = vmatprep.subr.mxu0 %v2922_v0 }
 0x7f6   :  { %2561 = vmatpush3.msra.mxu0 %v3389_v40 }
 0x7f7   :  { %2562 = vmatprep.subr.mxu0 %v2922_v0 }
 0x7f8   :  { %2563 = vmatpush3.msra.mxu0 %v3393_v41 }
 0x7f9   :  { %2564 = vmatprep.subr.mxu0 %v2922_v0 }
 0x7fa   :  { %2565 = vmatpush3.msra.mxu0 %v3397_v42 }
 0x7fb   :  { %2566 = vmatprep.subr.mxu0 %v2922_v0 }
 0x7fc   :  { %2567 = vmatpush3.msra.mxu0 %v3401_v44 }
 0x7fd   :  { %2568 = vmatprep.subr.mxu0 %v2922_v0 }
 0x7fe   :  { %2569 = vmatpush3.msra.mxu0 %v3405_v45 }
 0x7ff   :  { %2570 = vmatprep.subr.mxu0 %v2922_v0 }
 0x800   :  { %2571 = vmatpush3.msra.mxu0 %v3409_v46 }
 0x801   :  { %2572 = vmatprep.subr.mxu0 %v2922_v0 }
 0x802   :  { %2573 = vmatpush3.msra.mxu0 %v3413_v47 }
 0x803   :  { %2574 = vmatprep.subr.mxu0 %v2922_v0 }
 0x804   :  { %2575 = vmatpush3.msra.mxu0 %v3417_v48 }
 0x805   :  { %2576 = vmatprep.subr.mxu0 %v2922_v0 }
 0x806   :  { %2577 = vmatpush3.msra.mxu0 %v3421_v49 }
 0x807   :  { %2616 = vmatprep.subr.mxu0 %v2922_v0 }
 0x8a7   :  { %v1220_v10 = vpop.f32.mrf.mxu0 }
 0x8a8   :  { %v1224_v12 = vadd.f32 %v1220_v10, %v982_v8 }
 0x8a9   :  { %v2510_v14 = vpop.f32.mrf.mxu0 }
 0x8aa   :  { %2752 = vtanh.f32 %v1224_v12 }
 0x8b7   :  { %v2753_v16 = vpop.eup %2752 }
 0x8b8   :  { %2544 = vmatmul.mubr.f32.vlgmr.msra.gmra.mxu1 %v2753_v16 }
 0x8b9   :  { %2582 = vmatpush3.msra.mxu1 %v3362_v33  ;;  %2613 = vmatprep.mubr.msk.f32.mxu1 %vm2923_vm0, %v2922_v0 }
 0x8ba   :  { %2583 = vmatprep.subr.mxu1 %v2922_v0 }
 0x8bb   :  { %2584 = vmatpush3.msra.mxu1 %v3365_v34 }
 0x8bc   :  { %2585 = vmatprep.subr.mxu1 %v2922_v0 }
 0x8bd   :  { %2586 = vmatpush3.msra.mxu1 %v3369_v35 }
 0x8be   :  { %2587 = vmatprep.subr.mxu1 %v2922_v0 }
 0x8bf   :  { %2588 = vmatpush3.msra.mxu1 %v3373_v36 }
 0x8c0   :  { %2589 = vmatprep.subr.mxu1 %v2922_v0 }
 0x8c1   :  { %2590 = vmatpush3.msra.mxu1 %v3377_v37 }
 0x8c2   :  { %2591 = vmatprep.subr.mxu1 %v2922_v0 }
 0x8c3   :  { %2592 = vmatpush3.msra.mxu1 %v3381_v38 }
 0x8c4   :  { %2593 = vmatprep.subr.mxu1 %v2922_v0 }
 0x8c5   :  { %2594 = vmatpush3.msra.mxu1 %v3385_v39 }
 0x8c6   :  { %2595 = vmatprep.subr.mxu1 %v2922_v0 }
 0x8c7   :  { %2596 = vmatpush3.msra.mxu1 %v3389_v40 }
 0x8c8   :  { %2597 = vmatprep.subr.mxu1 %v2922_v0 }
 0x8c9   :  { %2598 = vmatpush3.msra.mxu1 %v3393_v41 }
 0x8ca   :  { %2599 = vmatprep.subr.mxu1 %v2922_v0 }
 0x8cb   :  { %2600 = vmatpush3.msra.mxu1 %v3397_v42 }
 0x8cc   :  { %2601 = vmatprep.subr.mxu1 %v2922_v0 }
 0x8cd   :  { %2602 = vmatpush3.msra.mxu1 %v3401_v44 }
 0x8ce   :  { %2603 = vmatprep.subr.mxu1 %v2922_v0 }
 0x8cf   :  { %2604 = vmatpush3.msra.mxu1 %v3405_v45 }
 0x8d0   :  { %2605 = vmatprep.subr.mxu1 %v2922_v0 }
 0x8d1   :  { %2606 = vmatpush3.msra.mxu1 %v3409_v46 }
 0x8d2   :  { %2607 = vmatprep.subr.mxu1 %v2922_v0 }
 0x8d3   :  { %2608 = vmatpush3.msra.mxu1 %v3413_v47 }
 0x8d4   :  { %2609 = vmatprep.subr.mxu1 %v2922_v0 }
 0x8d5   :  { %2610 = vmatpush3.msra.mxu1 %v3417_v48 }
 0x8d6   :  { %2611 = vmatprep.subr.mxu1 %v2922_v0 }
 0x8d7   :  { %2612 = vmatpush3.msra.mxu1 %v3421_v49 }
 0x8d8   :  { %2651 = vmatprep.subr.mxu1 %v2922_v0 }
 0x978   :  { %v1292_v20 = vpop.f32.mrf.mxu1 }
 0x979   :  { %v1296_v22 = vadd.f32 %v1292_v20, %v987_v18 }
 0x97a   :  { %v2545_v23 = vpop.f32.mrf.mxu1 }
 0x97b   :  { %2754 = vtanh.f32 %v1296_v22 }
 0x988   :  { %v2755_v24 = vpop.eup %2754 }
 0x989   :  { %2579 = vmatmul.mubr.f32.vlgmr.msra.gmra.mxu0 %v2755_v24 }
 0x98a   :  { %2617 = vmatpush3.msra.mxu0 %v3362_v33  ;;  %2648 = vmatprep.mubr.msk.f32.mxu0 %vm2923_vm0, %v2922_v0 }
 0x98b   :  { %2618 = vmatprep.subr.mxu0 %v2922_v0 }
 0x98c   :  { %2619 = vmatpush3.msra.mxu0 %v3365_v34 }
 0x98d   :  { %2620 = vmatprep.subr.mxu0 %v2922_v0 }
 0x98e   :  { %2621 = vmatpush3.msra.mxu0 %v3369_v35 }
 0x98f   :  { %2622 = vmatprep.subr.mxu0 %v2922_v0 }
 0x990   :  { %2623 = vmatpush3.msra.mxu0 %v3373_v36 }
 0x991   :  { %2624 = vmatprep.subr.mxu0 %v2922_v0 }
 0x992   :  { %2625 = vmatpush3.msra.mxu0 %v3377_v37 }
 0x993   :  { %2626 = vmatprep.subr.mxu0 %v2922_v0 }
 0x994   :  { %2627 = vmatpush3.msra.mxu0 %v3381_v38 }
 0x995   :  { %2628 = vmatprep.subr.mxu0 %v2922_v0 }
 0x996   :  { %2629 = vmatpush3.msra.mxu0 %v3385_v39 }
 0x997   :  { %2630 = vmatprep.subr.mxu0 %v2922_v0 }
 0x998   :  { %2631 = vmatpush3.msra.mxu0 %v3389_v40 }
 0x999   :  { %2632 = vmatprep.subr.mxu0 %v2922_v0 }
 0x99a   :  { %2633 = vmatpush3.msra.mxu0 %v3393_v41 }
 0x99b   :  { %2634 = vmatprep.subr.mxu0 %v2922_v0 }
 0x99c   :  { %2635 = vmatpush3.msra.mxu0 %v3397_v42 }
 0x99d   :  { %2636 = vmatprep.subr.mxu0 %v2922_v0 }
 0x99e   :  { %2637 = vmatpush3.msra.mxu0 %v3401_v44 }
 0x99f   :  { %2638 = vmatprep.subr.mxu0 %v2922_v0 }
 0x9a0   :  { %2639 = vmatpush3.msra.mxu0 %v3405_v45 }
 0x9a1   :  { %2640 = vmatprep.subr.mxu0 %v2922_v0 }
 0x9a2   :  { %2641 = vmatpush3.msra.mxu0 %v3409_v46 }
 0x9a3   :  { %2642 = vmatprep.subr.mxu0 %v2922_v0 }
 0x9a4   :  { %2643 = vmatpush3.msra.mxu0 %v3413_v47 }
 0x9a5   :  { %2644 = vmatprep.subr.mxu0 %v2922_v0 }
 0x9a6   :  { %2645 = vmatpush3.msra.mxu0 %v3417_v48 }
 0x9a7   :  { %2646 = vmatprep.subr.mxu0 %v2922_v0 }
 0x9a8   :  { %2647 = vmatpush3.msra.mxu0 %v3421_v49 }
 0x9a9   :  { %2686 = vmatprep.subr.mxu0 %v2922_v0 }
 0xa49   :  { %v1364_v26 = vpop.f32.mrf.mxu0 }
 0xa4a   :  { %v1368_v27 = vadd.f32 %v1364_v26, %v992_v25 }
 0xa4b   :  { %v2580_v28 = vpop.f32.mrf.mxu0 }
 0xa4c   :  { %2756 = vtanh.f32 %v1368_v27 }
 0xa59   :  { %v2757_v29 = vpop.eup %2756 }
 0xa5a   :  { %2614 = vmatmul.mubr.f32.vlgmr.msra.gmra.mxu1 %v2757_v29 }
 0xa5b   :  { %2652 = vmatpush3.msra.mxu1 %v3362_v33  ;;  %2683 = vmatprep.mubr.msk.f32.mxu1 %vm2923_vm0, %v2922_v0 }
 0xa5c   :  { %2653 = vmatprep.subr.mxu1 %v2922_v0 }
 0xa5d   :  { %2654 = vmatpush3.msra.mxu1 %v3365_v34 }
 0xa5e   :  { %2655 = vmatprep.subr.mxu1 %v2922_v0 }
 0xa5f   :  { %2656 = vmatpush3.msra.mxu1 %v3369_v35  ;;  %v1601_v35 = vld [vmem:[#allocation12 + $0x78] sm:$0xff] }
 0xa60   :  { %2657 = vmatprep.subr.mxu1 %v2922_v0 }
 0xa61   :  { %2658 = vmatpush3.msra.mxu1 %v3373_v36  ;;  %v1600_v36 = vld [vmem:[#allocation12 + $0x70] sm:$0xff] }
 0xa62   :  { %2659 = vmatprep.subr.mxu1 %v2922_v0 }
 0xa63   :  { %2660 = vmatpush3.msra.mxu1 %v3377_v37  ;;  %v1599_v37 = vld [vmem:[#allocation12 + $0x68] sm:$0xff] }
 0xa64   :  { %2661 = vmatprep.subr.mxu1 %v2922_v0 }
 0xa65   :  { %2662 = vmatpush3.msra.mxu1 %v3381_v38  ;;  %v1598_v38 = vld [vmem:[#allocation12 + $0x60] sm:$0xff] }
 0xa66   :  { %2663 = vmatprep.subr.mxu1 %v2922_v0 }
 0xa67   :  { %2664 = vmatpush3.msra.mxu1 %v3385_v39  ;;  %v1597_v39 = vld [vmem:[#allocation12 + $0x58] sm:$0xff] }
 0xa68   :  { %2665 = vmatprep.subr.mxu1 %v2922_v0 }
 0xa69   :  { %2666 = vmatpush3.msra.mxu1 %v3389_v40  ;;  %v1596_v40 = vld [vmem:[#allocation12 + $0x50] sm:$0xff] }
 0xa6a   :  { %2667 = vmatprep.subr.mxu1 %v2922_v0 }
 0xa6b   :  { %2668 = vmatpush3.msra.mxu1 %v3393_v41  ;;  %v1595_v41 = vld [vmem:[#allocation12 + $0x48] sm:$0xff] }
 0xa6c   :  { %2669 = vmatprep.subr.mxu1 %v2922_v0 }
 0xa6d   :  { %2670 = vmatpush3.msra.mxu1 %v3397_v42  ;;  %v1002_v42 = vadd.f32 %v3504_v63, %v3549_v17 }
 0xa6e   :  { %2671 = vmatprep.subr.mxu1 %v2922_v0 }
 0xa6f   :  { %2672 = vmatpush3.msra.mxu1 %v3401_v44 }
 0xa70   :  { %2673 = vmatprep.subr.mxu1 %v2922_v0 }
 0xa71   :  { %2674 = vmatpush3.msra.mxu1 %v3405_v45 }
 0xa72   :  { %2675 = vmatprep.subr.mxu1 %v2922_v0 }
 0xa73   :  { %2676 = vmatpush3.msra.mxu1 %v3409_v46 }
 0xa74   :  { %2677 = vmatprep.subr.mxu1 %v2922_v0 }
 0xa75   :  { %2678 = vmatpush3.msra.mxu1 %v3413_v47 }
 0xa76   :  { %2679 = vmatprep.subr.mxu1 %v2922_v0 }
 0xa77   :  { %2680 = vmatpush3.msra.mxu1 %v3417_v48  ;;  %v1594_v48 = vld [vmem:[#allocation12 + $0x40] sm:$0xff] }
 0xa78   :  { %2681 = vmatprep.subr.mxu1 %v2922_v0 }
 0xa79   :  { %2682 = vmatpush3.msra.mxu1 %v3421_v49  ;;  %v1593_v49 = vld [vmem:[#allocation12 + $0x38] sm:$0xff] }
 0xb1a   :  { %v1436_v31 = vpop.f32.mrf.mxu1 }
 0xb1b   :  { %v1440_v32 = vadd.f32 %v1436_v31, %v997_v30 }
 0xb1c   :  { %v2615_v33 = vpop.f32.mrf.mxu1 }
 0xb1d   :  { %2758 = vtanh.f32 %v1440_v32 }
 0xb2a   :  { %v2759_v34 = vpop.eup %2758 }
 0xb2b   :  { %2649 = vmatmul.mubr.f32.vlgmr.msra.gmra.mxu0 %v2759_v34 }
 0xb2c   :  { %2718 = vmatprep.mubr.msk.f32.mxu0 %vm2923_vm0, %v2922_v0  ;;  %2687 = vmatpush3.msra.mxu0 %v1601_v35 }
 0xb2d   :  { %2688 = vmatprep.subr.mxu0 %v2922_v0 }
 0xb2e   :  { %2689 = vmatpush3.msra.mxu0 %v1600_v36 }
 0xb2f   :  { %2690 = vmatprep.subr.mxu0 %v2922_v0 }
 0xb30   :  { %2691 = vmatpush3.msra.mxu0 %v1599_v37 }
 0xb31   :  { %2692 = vmatprep.subr.mxu0 %v2922_v0 }
 0xb32   :  { %2693 = vmatpush3.msra.mxu0 %v1598_v38 }
 0xb33   :  { %2694 = vmatprep.subr.mxu0 %v2922_v0 }
 0xb34   :  { %2695 = vmatpush3.msra.mxu0 %v1597_v39 }
 0xb35   :  { %2696 = vmatprep.subr.mxu0 %v2922_v0 }
 0xb36   :  { %2697 = vmatpush3.msra.mxu0 %v1596_v40 }
 0xb37   :  { %2698 = vmatprep.subr.mxu0 %v2922_v0 }
 0xb38   :  { %2699 = vmatpush3.msra.mxu0 %v1595_v41 }
 0xb39   :  { %2700 = vmatprep.subr.mxu0 %v2922_v0 }
 0xb3a   :  { %2701 = vmatpush3.msra.mxu0 %v1594_v48 }
 0xb3b   :  { %2702 = vmatprep.subr.mxu0 %v2922_v0 }
 0xb3c   :  { %2703 = vmatpush3.msra.mxu0 %v1593_v49 }
 0xb3d   :  { %2704 = vmatprep.subr.mxu0 %v2922_v0 }
 0xb3e   :  { %2705 = vmatpush3.msra.mxu0 %v1592_v50 }
 0xb3f   :  { %2706 = vmatprep.subr.mxu0 %v2922_v0 }
 0xb40   :  { %2707 = vmatpush3.msra.mxu0 %v1591_v51 }
 0xb41   :  { %2708 = vmatprep.subr.mxu0 %v2922_v0 }
 0xb42   :  { %2709 = vmatpush3.msra.mxu0 %v1590_v52 }
 0xb43   :  { %2710 = vmatprep.subr.mxu0 %v2922_v0 }
 0xb44   :  { %2711 = vmatpush3.msra.mxu0 %v1589_v55 }
 0xb45   :  { %2712 = vmatprep.subr.mxu0 %v2922_v0 }
 0xb46   :  { %2713 = vmatpush3.msra.mxu0 %v1588_v56 }
 0xb47   :  { %2714 = vmatprep.subr.mxu0 %v2922_v0 }
 0xb48   :  { %2715 = vmatpush3.msra.mxu0 %v1587_v54 }
 0xb49   :  { %2716 = vmatprep.subr.mxu0 %v2922_v0 }
 0xb4a   :  { %2717 = vmatpush3.msra.mxu0 %v1586_v57 }
 0xbeb   :  { %v1508_v44 = vpop.f32.mrf.mxu0 }
 0xbec   :  { %v1512_v45 = vadd.f32 %v1508_v44, %v1002_v42 }
 0xbed   :  { %v2650_v46 = vpop.f32.mrf.mxu0 }
 0xbee   :  { %2760 = vtanh.f32 %v1512_v45 }
 0xbfb   :  { %v2761_v47 = vpop.eup %2760 }
 0xbfc   :  { %2684 = vmatmul.mubr.f32.vlgmr.msra.gmra.mxu1 %v2761_v47 }
 0xcbc   :  { %v1580_v59 = vpop.f32.mrf.mxu1 }
 0xcbd   :  { %v1584_v60 = vadd.f32 %v1580_v59, %v1007_v58 }
 0xcbe   :  { %v2685_v61 = vpop.f32.mrf.mxu1 }
 0xcbf   :  { %2762 = vtanh.f32 %v1584_v60 }
 0xccc   :  { %v2763_v62 = vpop.eup %2762 }
 0xccd   :  { %2719 = vmatmul.mubr.f32.vlgmr.msra.gmra.mxu0 %v2763_v62 }
 0xd8d   :  { %v1675_v2 = vpop.f32.mrf.mxu0 }
 0xd8e   :  { %v1676_v43 = vadd.f32 %v1700_v1, %v1675_v2 }
 0xd8f   :  { %v2720_v0 = vpop.f32.mrf.mxu0 }
 0xd90   :  { %1679 = vst [vmem:[#allocation14] sm:$0xff] %v1676_v43 }
 0xd91   :  { %2895 = shalt.err (!%p2892_p6)
}
 0xd92   :  { %1689 = dma.vmem_to_hbm [thread:$0]  %s1687_s19, 128, %s3730_s9, [#allocation5]  }
 0xd93   :  { %2912 = dma.done.wait [#allocation5], 128  }
 0xd94   :  { %2913 = vsyncadd [#allocation5], 4294967168 }
 0xd95   :  { %1693 = vsyncpa [#allocation4], 1 }
 0xd96   :  { %1694 = vsyncpa [#allocation7], 1 }
 0xd97   :  { %1695 = vsyncpa [#allocation10], 1 }
 0xd98   :  { %1696 = vsyncpa [#allocation13], 1 }
 0xd99   :  { %1697 = vsyncpa [#allocation5], 1 }

</bundles_post_ra>
